<compile_context>
chip_gen: v6e
topology: v6e:2x2x1
jax: 0.10.0
libtpu: 0.0.40
codegen_flags: <defaults>
</compile_context>

<pallas_src>
import jax
import jax.numpy as jnp
from jax import lax
from jax.experimental import pallas as pl
from jax.experimental.pallas import tpu as pltpu


def _make_conv_bn_act_kernel(KH, KW, stride, dilation, H_out, W_out, C, O):
    HW = H_out * W_out

    def kernel(x_ref, w_ref, shift_ref, o_ref):
        # x_ref:     (1, Hp, Wp, C)        bf16  zero-padded NHWC image
        # w_ref:     (KH*KW, O, C)         bf16  conv weight, BN scale folded in
        # shift_ref: (O, 1)                f32   fused conv-bias + BN shift
        # o_ref:     (1, O, H_out*W_out)   f32   lane-dense, already NCHW-flat
        #
        # Seed the f32 accumulator with the fused shift so the epilogue is just
        # a ReLU (one fewer VPU pass over the (O, HW) tile).
        acc = jnp.broadcast_to(shift_ref[...], (O, HW)).astype(jnp.float32)
        for kh in range(KH):                       # unrolled at trace time
            for kw in range(KW):
                h0 = kh * dilation
                w0 = kw * dilation
                if stride == 1:
                    sl = x_ref[0, h0:h0 + H_out, w0:w0 + W_out, :]
                else:
                    sl = x_ref[0, pl.ds(h0, H_out, stride),
                               pl.ds(w0, W_out, stride), :]
                patch = sl.reshape(HW, C)          # (HW, C), lane dim = C
                # (O, C) x (HW, C)^T on the MXU, accumulate in f32.
                acc = acc + lax.dot_general(
                    w_ref[kh * KW + kw], patch,
                    dimension_numbers=(((1,), (1,)), ((), ())),
                    preferred_element_type=jnp.float32)
        o_ref[0] = jnp.maximum(acc, 0.0).astype(o_ref.dtype)   # ReLU epilogue

    return kernel


def conv_norm_act(x_nchw, weight, bias, gamma, beta, running_mean, running_var,
                  *, stride=1, padding=1, dilation=1, eps=1e-5):
    N, C, H, W = x_nchw.shape
    O, Cw, KH, KW = weight.shape
    assert Cw == C
    H_out = (H + 2 * padding - dilation * (KH - 1) - 1) // stride + 1
    W_out = (W + 2 * padding - dilation * (KW - 1) - 1) // stride + 1
    Hp, Wp = H + 2 * padding, W + 2 * padding
    HW = H_out * W_out

    # --- glue (XLA): NCHW -> NHWC (channels into lanes), zero pad, bf16 ---
    x = jnp.transpose(x_nchw, (0, 2, 3, 1))
    x = jnp.pad(x, ((0, 0), (padding, padding), (padding, padding), (0, 0)))
    x = x.astype(jnp.bfloat16)

    # --- fold conv bias + BatchNorm (eval mode) into weight scale / shift ---
    #   y = (conv(x, W) + bias - mean) * gamma / sqrt(var + eps) + beta
    #     =  conv(x, W * scale) + shift
    inv_std = lax.rsqrt(running_var.astype(jnp.float32) + eps)
    scale = gamma.astype(jnp.float32) * inv_std                              # (O,)
    shift = (bias.astype(jnp.float32) - running_mean.astype(jnp.float32)) * scale \
            + beta.astype(jnp.float32)                                       # (O,)

    # weight (O, C, KH, KW) -> (KH*KW, O, C), BN scale folded, bf16 MXU operand.
    w = jnp.transpose(weight.astype(jnp.float32), (2, 3, 0, 1)).reshape(KH * KW, O, C)
    w = (w * scale[None, :, None]).astype(jnp.bfloat16)
    shift_col = shift.reshape(O, 1)

    # Advisory cost hint for XLA's scheduler around the custom call.
    cost = pl.CostEstimate(
        flops=2 * N * O * HW * KH * KW * C,
        transcendentals=0,
        bytes_accessed=(N * Hp * Wp * C * 2 + KH * KW * O * C * 2
                        + O * 4 + N * O * HW * 4))

    kernel = _make_conv_bn_act_kernel(KH, KW, stride, dilation, H_out, W_out, C, O)
    out = pl.pallas_call(
        kernel,
        out_shape=jax.ShapeDtypeStruct((N, O, HW), jnp.float32),
        grid=(N,),
        in_specs=[
            pl.BlockSpec((1, Hp, Wp, C), lambda n: (n, 0, 0, 0)),   # one image
            pl.BlockSpec((KH * KW, O, C), lambda n: (0, 0, 0)),     # resident
            pl.BlockSpec((O, 1), lambda n: (0, 0)),                 # resident
        ],
        out_specs=pl.BlockSpec((1, O, HW), lambda n: (n, 0, 0)),
        compiler_params=pltpu.CompilerParams(
            dimension_semantics=("parallel",),        # shards batch across TCs (v7x)
            vmem_limit_bytes=32 * 1024 * 1024),       # fits v5e/v6e/v7x budgets
        cost_estimate=cost,
    )(x, w, shift_col)

    # (N, O, H_out*W_out) is already channel-major: pure metadata reshape to NCHW.
    return out.reshape(N, O, H_out, W_out)


def _reference(x, weight, bias, gamma, beta, rm, rv, *, stride, padding,
               dilation, eps=1e-5):
    """Full-precision reference for the module (Conv + BN(eval) + ReLU)."""
    y = lax.conv_general_dilated(
        x.astype(jnp.float32), weight.astype(jnp.float32),
        window_strides=(stride, stride),
        padding=((padding, padding), (padding, padding)),
        rhs_dilation=(dilation, dilation),
        dimension_numbers=('NCHW', 'OIHW', 'NCHW'),
        precision=lax.Precision.HIGHEST)
    y = y + bias.reshape(1, -1, 1, 1)
    y = (y - rm.reshape(1, -1, 1, 1)) / jnp.sqrt(rv.reshape(1, -1, 1, 1) + eps)
    y = y * gamma.reshape(1, -1, 1, 1) + beta.reshape(1, -1, 1, 1)
    return jnp.maximum(y, 0.0)


def _reference_bf16_operands(x, weight, bias, gamma, beta, rm, rv, *, stride,
                             padding, dilation, eps=1e-5):
    """Same math as the kernel (bf16-rounded operands, f32 accumulation)."""
    inv_std = lax.rsqrt(rv.astype(jnp.float32) + eps)
    scale = gamma.astype(jnp.float32) * inv_std
    shift = (bias.astype(jnp.float32) - rm.astype(jnp.float32)) * scale \
            + beta.astype(jnp.float32)
    xq = x.astype(jnp.bfloat16).astype(jnp.float32)
    wq = (weight.astype(jnp.float32) * scale[:, None, None, None]
          ).astype(jnp.bfloat16).astype(jnp.float32)
    y = lax.conv_general_dilated(
        xq, wq, window_strides=(stride, stride),
        padding=((padding, padding), (padding, padding)),
        rhs_dilation=(dilation, dilation),
        dimension_numbers=('NCHW', 'OIHW', 'NCHW'),
        precision=lax.Precision.HIGHEST)
    y = y + shift.reshape(1, -1, 1, 1)
    return jnp.maximum(y, 0.0)


if __name__ == "__main__":
    # ConvNormAct(in_chs=4, out_chs=8, kernel=3, stride=1) -> auto_pad = 1
    in_chs, out_chs, kernel_size, stride, padding, dilation = 4, 8, 3, 1, 1, 1
    N, H, W = 2, 16, 16

    key = jax.random.PRNGKey(0)
    kx, kw, kb, kg, kbe, krm, krv = jax.random.split(key, 7)

    x = jax.random.normal(kx, (N, in_chs, H, W), dtype=jnp.float32)
    weight = 0.1 * jax.random.normal(
        kw, (out_chs, in_chs, kernel_size, kernel_size), dtype=jnp.float32)
    bias = 0.1 * jax.random.normal(kb, (out_chs,), dtype=jnp.float32)
    # BatchNorm params (eval-mode semantics with running statistics).
    gamma = 1.0 + 0.1 * jax.random.normal(kg, (out_chs,), dtype=jnp.float32)
    beta = 0.1 * jax.random.normal(kbe, (out_chs,), dtype=jnp.float32)
    running_mean = 0.1 * jax.random.normal(krm, (out_chs,), dtype=jnp.float32)
    running_var = jnp.abs(1.0 + 0.1 * jax.random.normal(krv, (out_chs,),
                                                        dtype=jnp.float32))

    out = conv_norm_act(x, weight, bias, gamma, beta, running_mean, running_var,
                        stride=stride, padding=padding, dilation=dilation)
    out = jax.block_until_ready(out)

    ref_q = _reference_bf16_operands(x, weight, bias, gamma, beta,
                                     running_mean, running_var,
                                     stride=stride, padding=padding,
                                     dilation=dilation)
    ref_f32 = _reference(x, weight, bias, gamma, beta, running_mean, running_var,
                         stride=stride, padding=padding, dilation=dilation)

    assert out.shape == ref_f32.shape == (N, out_chs, H, W)
    # Tight check vs. identical math (bf16 operands, f32 accumulation).
    err_q = jnp.max(jnp.abs(out - ref_q))
    assert err_q < 1e-4, f"max abs err vs bf16-operand reference = {err_q}"
    # Loose check vs. the full-precision module reference (bf16 quantization only).
    err_f32 = jnp.max(jnp.abs(out - ref_f32))
    assert err_f32 < 5e-2, f"max abs err vs f32 reference = {err_f32}"

    print("KERNEL_OK")
</pallas_src>

<mosaic_0001>
module attributes {stable_mosaic.version = 11 : i64} {
  func.func @kernel(%arg0: i32, %arg1: memref<1x18x18x4xbf16, #tpu.memory_space<vmem>>, %arg2: memref<9x8x4xbf16, #tpu.memory_space<vmem>>, %arg3: memref<8x1xf32, #tpu.memory_space<vmem>>, %arg4: memref<1x8x256xf32, #tpu.memory_space<vmem>>) attributes {dimension_semantics = [#tpu.dimension_semantics<parallel>], iteration_bounds = array<i64: 2>, scalar_prefetch = 0 : i64, scratch_operands = 0 : i64, tpu.core_type = #tpu.core_type<tc>, window_params = [{transform_indices = @transform_0, window_bounds = array<i64: 1, 18, 18, 4>}, {pipeline_mode = #tpu.pipeline_mode<synchronous>, transform_indices = @transform_1, window_bounds = array<i64: 9, 8, 4>}, {pipeline_mode = #tpu.pipeline_mode<synchronous>, transform_indices = @transform_2, window_bounds = array<i64: 8, 1>}, {transform_indices = @transform_3, window_bounds = array<i64: 1, 8, 256>}]} {
    %c0 = arith.constant 0 : index
    %c0_0 = arith.constant 0 : index
    %0 = vector.load %arg3[%c0, %c0_0] : memref<8x1xf32, #tpu.memory_space<vmem>>, vector<8x1xf32>
    %1 = vector.shape_cast %0 : vector<8x1xf32> to vector<8x1xf32>
    %2 = vector.broadcast %1 : vector<8x1xf32> to vector<8x256xf32>
    %c0_1 = arith.constant 0 : index
    %c0_2 = arith.constant 0 : index
    %c0_3 = arith.constant 0 : index
    %c0_4 = arith.constant 0 : index
    %3 = vector.load %arg1[%c0_1, %c0_2, %c0_3, %c0_4] : memref<1x18x18x4xbf16, #tpu.memory_space<vmem>>, vector<1x16x16x4xbf16>
    %4 = vector.shape_cast %3 : vector<1x16x16x4xbf16> to vector<16x16x4xbf16>
    %5 = vector.shape_cast %4 : vector<16x16x4xbf16> to vector<256x4xbf16>
    %c0_5 = arith.constant 0 : index
    %c0_6 = arith.constant 0 : index
    %c0_7 = arith.constant 0 : index
    %6 = vector.load %arg2[%c0_5, %c0_6, %c0_7] : memref<9x8x4xbf16, #tpu.memory_space<vmem>>, vector<1x8x4xbf16>
    %7 = vector.shape_cast %6 : vector<1x8x4xbf16> to vector<8x4xbf16>
    %cst = arith.constant dense<0.000000e+00> : vector<8x256xf32>
    %8 = tpu.matmul %7, %5, %cst {dimension_numbers = #tpu.dot_dimension_numbers<[1], [1], [0], [0], [0, 0, 1, 0], [], []>} : vector<8x4xbf16>, vector<256x4xbf16>, vector<8x256xf32> -> vector<8x256xf32>
    %9 = arith.addf %2, %8 : vector<8x256xf32>
    %c0_8 = arith.constant 0 : index
    %c0_9 = arith.constant 0 : index
    %c1 = arith.constant 1 : index
    %c0_10 = arith.constant 0 : index
    %10 = vector.load %arg1[%c0_8, %c0_9, %c1, %c0_10] : memref<1x18x18x4xbf16, #tpu.memory_space<vmem>>, vector<1x16x16x4xbf16>
    %11 = vector.shape_cast %10 : vector<1x16x16x4xbf16> to vector<16x16x4xbf16>
    %12 = vector.shape_cast %11 : vector<16x16x4xbf16> to vector<256x4xbf16>
    %c1_11 = arith.constant 1 : index
    %c0_12 = arith.constant 0 : index
    %c0_13 = arith.constant 0 : index
    %13 = vector.load %arg2[%c1_11, %c0_12, %c0_13] : memref<9x8x4xbf16, #tpu.memory_space<vmem>>, vector<1x8x4xbf16>
    %14 = vector.shape_cast %13 : vector<1x8x4xbf16> to vector<8x4xbf16>
    %cst_14 = arith.constant dense<0.000000e+00> : vector<8x256xf32>
    %15 = tpu.matmul %14, %12, %cst_14 {dimension_numbers = #tpu.dot_dimension_numbers<[1], [1], [0], [0], [0, 0, 1, 0], [], []>} : vector<8x4xbf16>, vector<256x4xbf16>, vector<8x256xf32> -> vector<8x256xf32>
    %16 = arith.addf %9, %15 : vector<8x256xf32>
    %c0_15 = arith.constant 0 : index
    %c0_16 = arith.constant 0 : index
    %c2 = arith.constant 2 : index
    %c0_17 = arith.constant 0 : index
    %17 = vector.load %arg1[%c0_15, %c0_16, %c2, %c0_17] : memref<1x18x18x4xbf16, #tpu.memory_space<vmem>>, vector<1x16x16x4xbf16>
    %18 = vector.shape_cast %17 : vector<1x16x16x4xbf16> to vector<16x16x4xbf16>
    %19 = vector.shape_cast %18 : vector<16x16x4xbf16> to vector<256x4xbf16>
    %c2_18 = arith.constant 2 : index
    %c0_19 = arith.constant 0 : index
    %c0_20 = arith.constant 0 : index
    %20 = vector.load %arg2[%c2_18, %c0_19, %c0_20] : memref<9x8x4xbf16, #tpu.memory_space<vmem>>, vector<1x8x4xbf16>
    %21 = vector.shape_cast %20 : vector<1x8x4xbf16> to vector<8x4xbf16>
    %cst_21 = arith.constant dense<0.000000e+00> : vector<8x256xf32>
    %22 = tpu.matmul %21, %19, %cst_21 {dimension_numbers = #tpu.dot_dimension_numbers<[1], [1], [0], [0], [0, 0, 1, 0], [], []>} : vector<8x4xbf16>, vector<256x4xbf16>, vector<8x256xf32> -> vector<8x256xf32>
    %23 = arith.addf %16, %22 : vector<8x256xf32>
    %c0_22 = arith.constant 0 : index
    %c1_23 = arith.constant 1 : index
    %c0_24 = arith.constant 0 : index
    %c0_25 = arith.constant 0 : index
    %24 = vector.load %arg1[%c0_22, %c1_23, %c0_24, %c0_25] : memref<1x18x18x4xbf16, #tpu.memory_space<vmem>>, vector<1x16x16x4xbf16>
    %25 = vector.shape_cast %24 : vector<1x16x16x4xbf16> to vector<16x16x4xbf16>
    %26 = vector.shape_cast %25 : vector<16x16x4xbf16> to vector<256x4xbf16>
    %c3 = arith.constant 3 : index
    %c0_26 = arith.constant 0 : index
    %c0_27 = arith.constant 0 : index
    %27 = vector.load %arg2[%c3, %c0_26, %c0_27] : memref<9x8x4xbf16, #tpu.memory_space<vmem>>, vector<1x8x4xbf16>
    %28 = vector.shape_cast %27 : vector<1x8x4xbf16> to vector<8x4xbf16>
    %cst_28 = arith.constant dense<0.000000e+00> : vector<8x256xf32>
    %29 = tpu.matmul %28, %26, %cst_28 {dimension_numbers = #tpu.dot_dimension_numbers<[1], [1], [0], [0], [0, 0, 1, 0], [], []>} : vector<8x4xbf16>, vector<256x4xbf16>, vector<8x256xf32> -> vector<8x256xf32>
    %30 = arith.addf %23, %29 : vector<8x256xf32>
    %c0_29 = arith.constant 0 : index
    %c1_30 = arith.constant 1 : index
    %c1_31 = arith.constant 1 : index
    %c0_32 = arith.constant 0 : index
    %31 = vector.load %arg1[%c0_29, %c1_30, %c1_31, %c0_32] : memref<1x18x18x4xbf16, #tpu.memory_space<vmem>>, vector<1x16x16x4xbf16>
    %32 = vector.shape_cast %31 : vector<1x16x16x4xbf16> to vector<16x16x4xbf16>
    %33 = vector.shape_cast %32 : vector<16x16x4xbf16> to vector<256x4xbf16>
    %c4 = arith.constant 4 : index
    %c0_33 = arith.constant 0 : index
    %c0_34 = arith.constant 0 : index
    %34 = vector.load %arg2[%c4, %c0_33, %c0_34] : memref<9x8x4xbf16, #tpu.memory_space<vmem>>, vector<1x8x4xbf16>
    %35 = vector.shape_cast %34 : vector<1x8x4xbf16> to vector<8x4xbf16>
    %cst_35 = arith.constant dense<0.000000e+00> : vector<8x256xf32>
    %36 = tpu.matmul %35, %33, %cst_35 {dimension_numbers = #tpu.dot_dimension_numbers<[1], [1], [0], [0], [0, 0, 1, 0], [], []>} : vector<8x4xbf16>, vector<256x4xbf16>, vector<8x256xf32> -> vector<8x256xf32>
    %37 = arith.addf %30, %36 : vector<8x256xf32>
    %c0_36 = arith.constant 0 : index
    %c1_37 = arith.constant 1 : index
    %c2_38 = arith.constant 2 : index
    %c0_39 = arith.constant 0 : index
    %38 = vector.load %arg1[%c0_36, %c1_37, %c2_38, %c0_39] : memref<1x18x18x4xbf16, #tpu.memory_space<vmem>>, vector<1x16x16x4xbf16>
    %39 = vector.shape_cast %38 : vector<1x16x16x4xbf16> to vector<16x16x4xbf16>
    %40 = vector.shape_cast %39 : vector<16x16x4xbf16> to vector<256x4xbf16>
    %c5 = arith.constant 5 : index
    %c0_40 = arith.constant 0 : index
    %c0_41 = arith.constant 0 : index
    %41 = vector.load %arg2[%c5, %c0_40, %c0_41] : memref<9x8x4xbf16, #tpu.memory_space<vmem>>, vector<1x8x4xbf16>
    %42 = vector.shape_cast %41 : vector<1x8x4xbf16> to vector<8x4xbf16>
    %cst_42 = arith.constant dense<0.000000e+00> : vector<8x256xf32>
    %43 = tpu.matmul %42, %40, %cst_42 {dimension_numbers = #tpu.dot_dimension_numbers<[1], [1], [0], [0], [0, 0, 1, 0], [], []>} : vector<8x4xbf16>, vector<256x4xbf16>, vector<8x256xf32> -> vector<8x256xf32>
    %44 = arith.addf %37, %43 : vector<8x256xf32>
    %c0_43 = arith.constant 0 : index
    %c2_44 = arith.constant 2 : index
    %c0_45 = arith.constant 0 : index
    %c0_46 = arith.constant 0 : index
    %45 = vector.load %arg1[%c0_43, %c2_44, %c0_45, %c0_46] : memref<1x18x18x4xbf16, #tpu.memory_space<vmem>>, vector<1x16x16x4xbf16>
    %46 = vector.shape_cast %45 : vector<1x16x16x4xbf16> to vector<16x16x4xbf16>
    %47 = vector.shape_cast %46 : vector<16x16x4xbf16> to vector<256x4xbf16>
    %c6 = arith.constant 6 : index
    %c0_47 = arith.constant 0 : index
    %c0_48 = arith.constant 0 : index
    %48 = vector.load %arg2[%c6, %c0_47, %c0_48] : memref<9x8x4xbf16, #tpu.memory_space<vmem>>, vector<1x8x4xbf16>
    %49 = vector.shape_cast %48 : vector<1x8x4xbf16> to vector<8x4xbf16>
    %cst_49 = arith.constant dense<0.000000e+00> : vector<8x256xf32>
    %50 = tpu.matmul %49, %47, %cst_49 {dimension_numbers = #tpu.dot_dimension_numbers<[1], [1], [0], [0], [0, 0, 1, 0], [], []>} : vector<8x4xbf16>, vector<256x4xbf16>, vector<8x256xf32> -> vector<8x256xf32>
    %51 = arith.addf %44, %50 : vector<8x256xf32>
    %c0_50 = arith.constant 0 : index
    %c2_51 = arith.constant 2 : index
    %c1_52 = arith.constant 1 : index
    %c0_53 = arith.constant 0 : index
    %52 = vector.load %arg1[%c0_50, %c2_51, %c1_52, %c0_53] : memref<1x18x18x4xbf16, #tpu.memory_space<vmem>>, vector<1x16x16x4xbf16>
    %53 = vector.shape_cast %52 : vector<1x16x16x4xbf16> to vector<16x16x4xbf16>
    %54 = vector.shape_cast %53 : vector<16x16x4xbf16> to vector<256x4xbf16>
    %c7 = arith.constant 7 : index
    %c0_54 = arith.constant 0 : index
    %c0_55 = arith.constant 0 : index
    %55 = vector.load %arg2[%c7, %c0_54, %c0_55] : memref<9x8x4xbf16, #tpu.memory_space<vmem>>, vector<1x8x4xbf16>
    %56 = vector.shape_cast %55 : vector<1x8x4xbf16> to vector<8x4xbf16>
    %cst_56 = arith.constant dense<0.000000e+00> : vector<8x256xf32>
    %57 = tpu.matmul %56, %54, %cst_56 {dimension_numbers = #tpu.dot_dimension_numbers<[1], [1], [0], [0], [0, 0, 1, 0], [], []>} : vector<8x4xbf16>, vector<256x4xbf16>, vector<8x256xf32> -> vector<8x256xf32>
    %58 = arith.addf %51, %57 : vector<8x256xf32>
    %c0_57 = arith.constant 0 : index
    %c2_58 = arith.constant 2 : index
    %c2_59 = arith.constant 2 : index
    %c0_60 = arith.constant 0 : index
    %59 = vector.load %arg1[%c0_57, %c2_58, %c2_59, %c0_60] : memref<1x18x18x4xbf16, #tpu.memory_space<vmem>>, vector<1x16x16x4xbf16>
    %60 = vector.shape_cast %59 : vector<1x16x16x4xbf16> to vector<16x16x4xbf16>
    %61 = vector.shape_cast %60 : vector<16x16x4xbf16> to vector<256x4xbf16>
    %c8 = arith.constant 8 : index
    %c0_61 = arith.constant 0 : index
    %c0_62 = arith.constant 0 : index
    %62 = vector.load %arg2[%c8, %c0_61, %c0_62] : memref<9x8x4xbf16, #tpu.memory_space<vmem>>, vector<1x8x4xbf16>
    %63 = vector.shape_cast %62 : vector<1x8x4xbf16> to vector<8x4xbf16>
    %cst_63 = arith.constant dense<0.000000e+00> : vector<8x256xf32>
    %64 = tpu.matmul %63, %61, %cst_63 {dimension_numbers = #tpu.dot_dimension_numbers<[1], [1], [0], [0], [0, 0, 1, 0], [], []>} : vector<8x4xbf16>, vector<256x4xbf16>, vector<8x256xf32> -> vector<8x256xf32>
    %65 = arith.addf %58, %64 : vector<8x256xf32>
    %cst_64 = arith.constant 0.000000e+00 : f32
    %66 = vector.broadcast %cst_64 : f32 to vector<8x256xf32>
    %67 = arith.maximumf %65, %66 : vector<8x256xf32>
    %c0_65 = arith.constant 0 : index
    %c0_66 = arith.constant 0 : index
    %c0_67 = arith.constant 0 : index
    %68 = vector.load %arg4[%c0_65, %c0_66, %c0_67] : memref<1x8x256xf32, #tpu.memory_space<vmem>>, vector<1x8x256xf32>
    %69 = vector.shape_cast %68 : vector<1x8x256xf32> to vector<8x256xf32>
    %70 = vector.shape_cast %67 : vector<8x256xf32> to vector<1x8x256xf32>
    tpu.vector_store %arg4[%c0_65, %c0_66, %c0_67], %70 {strides = array<i32>} : memref<1x8x256xf32, #tpu.memory_space<vmem>>, vector<1x8x256xf32>,
    return
  }
  func.func @transform_0(%arg0: i32) -> (i32, i32, i32, i32) {
    %c0_i32 = arith.constant 0 : i32
    %c0_i32_0 = arith.constant 0 : i32
    %c0_i32_1 = arith.constant 0 : i32
    %c0_i32_2 = arith.constant 0 : i32
    return %arg0, %c0_i32, %c0_i32_0, %c0_i32_1 : i32, i32, i32, i32
  }
  func.func @transform_1(%arg0: i32) -> (i32, i32, i32) {
    %c0_i32 = arith.constant 0 : i32
    %c0_i32_0 = arith.constant 0 : i32
    %c0_i32_1 = arith.constant 0 : i32
    %c0_i32_2 = arith.constant 0 : i32
    return %c0_i32, %c0_i32_0, %c0_i32_1 : i32, i32, i32
  }
  func.func @transform_2(%arg0: i32) -> (i32, i32) {
    %c0_i32 = arith.constant 0 : i32
    %c0_i32_0 = arith.constant 0 : i32
    %c0_i32_1 = arith.constant 0 : i32
    return %c0_i32, %c0_i32_0 : i32, i32
  }
  func.func @transform_3(%arg0: i32) -> (i32, i32, i32) {
    %c0_i32 = arith.constant 0 : i32
    %c0_i32_0 = arith.constant 0 : i32
    %c0_i32_1 = arith.constant 0 : i32
    return %arg0, %c0_i32, %c0_i32_0 : i32, i32, i32
  }
}

</mosaic_0001>

<bundles_post_ra>
// kernel: tpu_custom_call.1
= control target key start
LH: loop header
LB: loop body
LE: loop exit
PB: predicated region body
PF: predicated region fallthrough
CT: control target
= control target key end

     0   :  { %8 = vsyncpa [#allocation3], 0  ;;  %s5959_s0 = inlined_call_operand.vmem [shape: bf16[2,18,18,4], index: 0, kind: input, shape index: {}]   ;;  %s5960_s1 = inlined_call_operand.vmem [shape: bf16[9,8,4], index: 1, kind: input, shape index: {}]   ;;  %s5961_s2 = inlined_call_operand.vmem [shape: f32[8,1], index: 2, kind: input, shape index: {}]   ;;  %s5962_s3 = inlined_call_operand.hbm [shape: f32[2,8,256], index: 3, kind: output, shape index: {}]  }
   0x1   :  { %10 = vsyncpa [#allocation3 + $0x1], 0  ;;  %s4396_s12 = smov 0   ;;  %s4398_s13 = smov 0  }
   0x2   :  { %s4400_s14 = smov 0   ;;  %s4402_s15 = smov 0  }
   0x3 LB: > { %s4417_s16 = sadd.s32 4294967295, %s4372_s15   ;;  %s3574_s17 = sadd.s32 4294967294, %s4372_s15   ;;  %s4372_s15 = sphi %s4402_s15, %s5972_s15   ;;  %s4368_s14 = sphi %s4400_s14, %s5971_s14   ;;  %s4364_s13 = sphi %s4398_s13, %s5970_s13   ;;  %s4360_s12 = sphi %s4396_s12, %s5969_s12  }
   0x4   : > { %s4421_s18 = sadd.s32 1, %s4372_s15   ;;  %s91_s19 = sadd.s32 1, %s4368_s14 }
   0x5   : > { %s88_s20 = ssub.s32 %s4372_s15, %s4421_s18  ;;  %p101_p0 = scmp.ne.s32.totalorder %s4368_s14, %s4364_s13 }
   0x6   : > { %p89_p1 = scmp.eq.s32.totalorder %s88_s20, 0  ;;  %p102_p2 = scmp.eq.s32.totalorder %s4417_s16, 1 }
   0x7   : > { %p107_p3 = scmp.ne.s32.totalorder %s4364_s13, %s4360_s12  ;;  %p108_p4 = scmp.eq.s32.totalorder %s3574_s17, 1 }
   0x8   : > { %s4432_s21 = scalar_select %p89_p1, %s4368_s14, %s91_s19  }
   0x9   : > { %p4434_p5 = por %p102_p2, %p101_p0  ;;  %p4438_p6 = por %p108_p4, %p107_p3 }
   0xa   : > { %p3577_p7 = scmp.ge.s32.totalorder %s4372_s15, 1  ;;  %p140_p8 = scmp.lt.s32.totalorder %s4372_s15, 3 }
   0xc   : > { %p141_p9 = pnand %p3577_p7, %p140_p8 }
   0xd   : > { %p164_p10 = scmp.lt.s32.totalorder (!%p141_p9), %s4417_s16, 1  ;;  %s3986_s8 = sshll.u32 (!%p141_p9), %s4417_s16, 8 }
   0xe   : > { %144 = sbr.rel (%p141_p9) target bundleno = 581 (0x245), region = 32  ;;  %s5924_s19 = scalar_lea.hbm (!%p141_p9), %s5962_s3, %s3986_s8 }
  0x13   : > { %vm289_vm0 = vcmask 31744   ;;  %v4448_v0 = vld [vmem:[%s5960_s1] sm:$0xf]  ;;  %v3597_v1 = vld [vmem:[%s5960_s1 + $0x4] sm:$0xf]  ;;  %s165_s28 = scalar_select %p164_p10, %s4417_s16, 1 }
  0x14   : > { %4003 = vmatprep.mubr.msk.bf16.mxu0 %vm289_vm0, %v4448_v0  ;;  %4021 = vmatprep.mubr.msk.bf16.mxu1 %vm289_vm0, %v3597_v1  ;;  %vm432_vm1 = vsmask.f32 3328  ;;  %vm433_vm2 = vsmask.f32 7440  ;;  %vm1027_vm4 = vcmask 1042432   ;;  %vm1028_vm5 = vcmask 1046532  }
  0x15   : > { %s4221_s29 = smul.u32 216, %s165_s28  ;;  %vm4495_vm3 = vmor %vm432_vm1, %vm433_vm2  ;;  %s4375_s16 = smov [#allocation2]  }
  0x16   : > { %vm4704_vm6 = vmor %vm1027_vm4, %vm1028_vm5  ;;  %s4316_s25 = sshll.u32 %s4375_s16, 4  ;;  %s4317_s25 = int_to_ptr.vmem [resolvable:$false] %s4316_s25 }
  0x17   : > { %s4460_s5 = scalar_lea.vmem %s5959_s0, %s4221_s29  ;;  %s4318_s26 = scalar_lea.vmem %s4317_s25, 512 }
  0x18   : > { %v4263_v2 = vld [vmem:[%s4460_s5 + $0xb4] sm:$0xff]   ;;  %v4265_v4 = vld [vmem:[%s4460_s5 + $0xa8] sm:$0xff]   ;;  %v4473_v9 = vld [vmem:[%s4460_s5 + $0xbc] sm:$0x1] }
  0x19   : > { %v4264_v3 = vld [vmem:[%s4460_s5 + $0x54] sm:$0xff]   ;;  %4149 = vmatprep.subr.msk.bf16.mxu0 %vm289_vm0, %v4263_v2  ;;  %v4266_v6 = vld [vmem:[%s4460_s5 + $0x48] sm:$0xff]   ;;  %v815_v16 = vshll.u32 %v4473_v9, 16  ;;  %v4486_v22 = vld [vmem:[%s4460_s5 + $0x5c] sm:$0x1]  ;;  %v1140_v25 = vrot.slane %v4473_v9, 5 }
  0x1a   : > { %v315_v5 = vsel %vm289_vm0, %v4264_v3, 0  ;;  %v429_v7 = vld [vmem:[%s4460_s5 + $0xb4] sm:$0xf]  ;;  %v4470_v8 = vld [vmem:[%s4460_s5 + $0xb8] sm:$0xf]  ;;  %v312_v14 = vsel %vm289_vm0, %v4266_v6, 0 }
  0x1b   : > { %3988 = vmatpush3.bf16.xpose.msra.mxu0 %v315_v5  ;;  %v796_v10 = vshrl.u32 %v429_v7, 16  ;;  %v799_v11 = vshll.u32 %v429_v7, 16  ;;  %v805_v12 = vshll.u32 %v4470_v8, 16  ;;  %v405_v13 = vld [vmem:[%s4460_s5 + $0x54] sm:$0xf]  ;;  %v809_v15 = vshrl.u32 %v4470_v8, 16 }
  0x1c   : > { %4150 = vmatprep.subr.msk.bf16.mxu0 %vm289_vm0, %v4265_v4  ;;  %v1137_v17 = vrot.slane %v4470_v8, 5  ;;  %v4483_v18 = vld [vmem:[%s4460_s5 + $0x58] sm:$0xf]  ;;  %v604_v23 = vshrl.u32 %v405_v13, 16  ;;  %v607_v26 = vshll.u32 %v405_v13, 16  ;;  %v623_v31 = vshll.u32 %v4486_v22, 16 }
  0x1d   : > { %v798_v19 = vrot.slane %v796_v10, 4  ;;  %v801_v20 = vrot.slane %v799_v11, 5  ;;  %v807_v21 = vrot.slane %v805_v12, 5  ;;  %v811_v24 = vrot.slane %v809_v15, 4  ;;  %v4267_v32 = vld [vmem:[%s4460_s5 + $0x9c] sm:$0xff]   ;;  %v4269_v1 = vld [vmem:[%s4460_s5 + $0x90] sm:$0xff]  }
  0x1e   : > { %v613_v27 = vshll.u32 %v4483_v18, 16  ;;  %v606_v29 = vrot.slane %v604_v23, 4  ;;  %v617_v30 = vshrl.u32 %v4483_v18, 16  ;;  %v817_v35 = vrot.slane %v815_v16, 5  ;;  %v4268_v38 = vld [vmem:[%s4460_s5 + $0x3c] sm:$0xff]   ;;  %v4270_v6 = vld [vmem:[%s4460_s5 + $0x30] sm:$0xff]  }
  0x1f   : > { %v802_v28 = vor.u32 %v801_v20, %v798_v19  ;;  %v812_v34 = vor.u32 %v811_v24, %v807_v21  ;;  %v609_v36 = vrot.slane %v607_v26, 5  ;;  %v625_v41 = vrot.slane %v623_v31, 5  ;;  %v426_v46 = vld [vmem:[%s4460_s5 + $0xa8] sm:$0xf]  ;;  %v4504_v47 = vld [vmem:[%s4460_s5 + $0xac] sm:$0xf] }
  0x20   : > { %v615_v37 = vrot.slane %v613_v27, 5  ;;  %v619_v40 = vrot.slane %v617_v30, 4  ;;  %v1084_v42 = vrot.slane %v4486_v22, 5  ;;  %v309_v45 = vsel %vm289_vm0, %v4268_v38, 0  ;;  %v4510_v50 = vld [vmem:[%s4460_s5 + $0xb0] sm:$0x1] }
  0x21   : > { %v803_v39 = vrot.slane %v802_v28, 4  ;;  %v813_v43 = vrot.slane %v812_v34, 4  ;;  %v610_v44 = vor.u32 %v609_v36, %v606_v29  ;;  %v772_v51 = vshrl.u32 %v426_v46, 16  ;;  %v402_v53 = vld [vmem:[%s4460_s5 + $0x48] sm:$0xf] }
  0x22   : > { %v620_v49 = vor.u32 %v619_v40, %v615_v37  ;;  %v775_v52 = vshll.u32 %v426_v46, 16  ;;  %v781_v56 = vshll.u32 %v4504_v47, 16  ;;  %v785_v57 = vshrl.u32 %v4504_v47, 16  ;;  %v4518_v58 = vld [vmem:[%s4460_s5 + $0x4c] sm:$0xf] }
  0x23   : > { %3990 = vmatpush3.bf16.xpose.msra.mxu0 %v312_v14  ;;  %v808_v48 = vsel %vm4495_vm3, %v803_v39, %v807_v21  ;;  %v818_v54 = vsel %vm4495_vm3, %v813_v43, %v817_v35  ;;  %v611_v55 = vrot.slane %v610_v44, 4  ;;  %v774_v61 = vrot.slane %v772_v51, 4  ;;  %v4521_v63 = vld [vmem:[%s4460_s5 + $0x50] sm:$0x1]  ;;  %v423_v24 = vld [vmem:[%s4460_s5 + $0x9c] sm:$0xf] }
  0x24   : > { %4151 = vmatprep.subr.msk.bf16.mxu0 %vm289_vm0, %v4267_v32  ;;  %v3613_v59 = vcombine.low %v808_v48, %v818_v54  ;;  %v621_v60 = vrot.slane %v620_v49, 4  ;;  %v777_v62 = vrot.slane %v775_v52, 5  ;;  %v783_v3 = vrot.slane %v781_v56, 5  ;;  %v4537_v30 = vld [vmem:[%s4460_s5 + $0xa0] sm:$0xf]  ;;  %v4271_v49 = vld [vmem:[%s4460_s5 + $0x84] sm:$0xff]  }
  0x25   : > { %v616_v2 = vsel %vm4495_vm3, %v611_v55, %v615_v37  ;;  %v787_v4 = vrot.slane %v785_v57, 4  ;;  %v791_v5 = vshll.u32 %v4510_v50, 16  ;;  %v580_v11 = vshrl.u32 %v402_v53, 16  ;;  %v4544_v36 = vld [vmem:[%s4460_s5 + $0xa4] sm:$0x1] }
  0x26   : > { %4157 = vmatprep.subr.msk.bf16.mxu1 %vm289_vm0, %v3613_v59  ;;  %v626_v7 = vsel %vm4495_vm3, %v621_v60, %v625_v41  ;;  %v778_v10 = vor.u32 %v777_v62, %v774_v61  ;;  %v583_v12 = vshll.u32 %v402_v53, 16  ;;  %v589_v16 = vshll.u32 %v4518_v58, 16  ;;  %v399_v37 = vld [vmem:[%s4460_s5 + $0x3c] sm:$0xf]  ;;  %v4550_v43 = vld [vmem:[%s4460_s5 + $0x40] sm:$0xf] }
  0x27   : > { %v3605_v13 = vcombine.low %v616_v2, %v626_v7  ;;  %v788_v14 = vor.u32 %v787_v4, %v783_v3  ;;  %v793_v15 = vrot.slane %v791_v5, 5  ;;  %v582_v20 = vrot.slane %v580_v11, 4  ;;  %v4272_v60 = vld [vmem:[%s4460_s5 + $0x24] sm:$0xff]  }
  0x28   : > { %v779_v19 = vrot.slane %v778_v10, 4  ;;  %v585_v21 = vrot.slane %v583_v12, 5  ;;  %v593_v23 = vshrl.u32 %v4518_v58, 16  ;;  %v591_v28 = vrot.slane %v589_v16, 5  ;;  %v4561_v2 = vld [vmem:[%s4460_s5 + $0x44] sm:$0x1] }
  0x29   : > { %v894_v26 = vsel %vm289_vm0, %v3605_v13, 0  ;;  %v789_v27 = vrot.slane %v788_v14, 4  ;;  %v599_v29 = vshll.u32 %v4521_v63, 16  ;;  %v306_v35 = vsel %vm289_vm0, %v4270_v6, 0  ;;  %v420_v14 = vld [vmem:[%s4460_s5 + $0x90] sm:$0xf] }
  0x2a   : > { %4006 = vmatpush3.bf16.xpose.msra.mxu1 %v894_v26  ;;  %v784_v31 = vsel %vm4495_vm3, %v779_v19, %v783_v3  ;;  %v586_v32 = vor.u32 %v585_v21, %v582_v20  ;;  %v595_v34 = vrot.slane %v593_v23, 4  ;;  %v748_v40 = vshrl.u32 %v423_v24, 16  ;;  %v4575_v23 = vld [vmem:[%s4460_s5 + $0x98] sm:$0x1] }
  0x2b   : > { %3992 = vmatpush3.bf16.xpose.msra.mxu0 %v309_v45  ;;  %v794_v38 = vsel %vm4495_vm3, %v789_v27, %v793_v15  ;;  %v601_v39 = vrot.slane %v599_v29, 5  ;;  %v751_v41 = vshll.u32 %v423_v24, 16  ;;  %v757_v48 = vshll.u32 %v4537_v30, 16  ;;  %v4569_v15 = vld [vmem:[%s4460_s5 + $0x94] sm:$0xf] }
  0x2c   : > { %4152 = vmatprep.subr.msk.bf16.mxu0 %vm289_vm0, %v4269_v1  ;;  %v3612_v44 = vcombine.low %v784_v31, %v794_v38  ;;  %v587_v45 = vrot.slane %v586_v32, 4  ;;  %v596_v46 = vor.u32 %v595_v34, %v591_v28  ;;  %v750_v51 = vrot.slane %v748_v40, 4  ;;  %v396_v29 = vld [vmem:[%s4460_s5 + $0x30] sm:$0xf] }
  0x2d   : > { %v753_v52 = vrot.slane %v751_v41, 5  ;;  %v761_v53 = vshrl.u32 %v4537_v30, 16  ;;  %v767_v54 = vshll.u32 %v4544_v36, 16  ;;  %v759_v57 = vrot.slane %v757_v48, 5 }
  0x2e   : > { %4158 = vmatprep.subr.msk.bf16.mxu1 %vm289_vm0, %v3612_v44  ;;  %v592_v55 = vsel %vm4495_vm3, %v587_v45, %v591_v28  ;;  %v597_v56 = vrot.slane %v596_v46, 4  ;;  %v556_v59 = vshrl.u32 %v399_v37, 16  ;;  %v559_v3 = vshll.u32 %v399_v37, 16  ;;  %v4582_v37 = vld [vmem:[%s4460_s5 + $0x34] sm:$0xf] }
  0x2f   : > { %v754_v61 = vor.u32 %v753_v52, %v750_v51  ;;  %v763_v62 = vrot.slane %v761_v53, 4  ;;  %v769_v1 = vrot.slane %v767_v54, 5  ;;  %v565_v6 = vshll.u32 %v4550_v43, 16 }
  0x30   : > { %v602_v4 = vsel %vm4495_vm3, %v597_v56, %v601_v39  ;;  %v558_v5 = vrot.slane %v556_v59, 4  ;;  %v569_v7 = vshrl.u32 %v4550_v43, 16  ;;  %v561_v13 = vrot.slane %v559_v3, 5 }
  0x31   : > { %v3604_v10 = vcombine.low %v592_v55, %v602_v4  ;;  %v755_v11 = vrot.slane %v754_v61, 4  ;;  %v764_v12 = vor.u32 %v763_v62, %v759_v57  ;;  %v567_v16 = vrot.slane %v565_v6, 5  ;;  %v4274_v61 = vld [vmem:[%s4460_s5 + $0x18] sm:$0xff]   ;;  %v4602_v6 = vld [vmem:[%s4460_s5 + $0x88] sm:$0xf] }
  0x32   : > { %v571_v19 = vrot.slane %v569_v7, 4  ;;  %v575_v20 = vshll.u32 %v4561_v2, 16  ;;  %v303_v21 = vsel %vm289_vm0, %v4272_v60, 0  ;;  %v562_v28 = vor.u32 %v561_v13, %v558_v5  ;;  %v417_v5 = vld [vmem:[%s4460_s5 + $0x84] sm:$0xf] }
  0x33   : > { %3994 = vmatpush3.bf16.xpose.msra.mxu0 %v306_v35  ;;  %v891_v24 = vsel %vm289_vm0, %v3604_v10, 0  ;;  %v760_v26 = vsel %vm4495_vm3, %v755_v11, %v759_v57  ;;  %v765_v27 = vrot.slane %v764_v12, 4  ;;  %v724_v34 = vshrl.u32 %v420_v14, 16  ;;  %v4596_v57 = vld [vmem:[%s4460_s5 + $0x38] sm:$0x1] }
  0x34   : > { %4153 = vmatprep.subr.msk.bf16.mxu0 %vm289_vm0, %v4271_v49  ;;  %4008 = vmatpush3.bf16.xpose.msra.mxu1 %v891_v24  ;;  %v572_v31 = vor.u32 %v571_v19, %v567_v16  ;;  %v577_v32 = vrot.slane %v575_v20, 5  ;;  %v727_v35 = vshll.u32 %v420_v14, 16  ;;  %v563_v39 = vrot.slane %v562_v28, 4  ;;  %v4273_v49 = vld [vmem:[%s4460_s5 + $0x78] sm:$0xff]   ;;  %v4607_v13 = vld [vmem:[%s4460_s5 + $0x8c] sm:$0x1] }
  0x35   : > { %v770_v38 = vsel %vm4495_vm3, %v765_v27, %v769_v1  ;;  %v733_v40 = vshll.u32 %v4569_v15, 16  ;;  %v737_v41 = vshrl.u32 %v4569_v15, 16  ;;  %v726_v46 = vrot.slane %v724_v34, 4 }
  0x36   : > { %v3611_v44 = vcombine.low %v760_v26, %v770_v38  ;;  %v573_v45 = vrot.slane %v572_v31, 4  ;;  %v729_v48 = vrot.slane %v727_v35, 5  ;;  %v568_v51 = vsel %vm4495_vm3, %v563_v39, %v567_v16 }
  0x37   : > { %v735_v52 = vrot.slane %v733_v40, 5  ;;  %v739_v53 = vrot.slane %v737_v41, 4  ;;  %v743_v54 = vshll.u32 %v4575_v23, 16  ;;  %v532_v59 = vshrl.u32 %v396_v29, 16  ;;  %v4275_v41 = vld [vmem:[%s4460_s5 + $0x6c] sm:$0xff]  }
  0x38   : > { %4159 = vmatprep.subr.msk.bf16.mxu1 %vm289_vm0, %v3611_v44  ;;  %v578_v55 = vsel %vm4495_vm3, %v573_v45, %v577_v32  ;;  %v730_v56 = vor.u32 %v729_v48, %v726_v46  ;;  %v535_v60 = vshll.u32 %v396_v29, 16  ;;  %v541_v4 = vshll.u32 %v4582_v37, 16 }
  0x39   : > { %v3603_v62 = vcombine.low %v568_v51, %v578_v55  ;;  %v740_v1 = vor.u32 %v739_v53, %v735_v52  ;;  %v745_v3 = vrot.slane %v743_v54, 5  ;;  %v534_v10 = vrot.slane %v532_v59, 4  ;;  %v4628_v54 = vld [vmem:[%s4460_s5 + $0x2c] sm:$0x1] }
  0x3a   : > { %v731_v7 = vrot.slane %v730_v56, 4  ;;  %v537_v11 = vrot.slane %v535_v60, 5  ;;  %v545_v12 = vshrl.u32 %v4582_v37, 16  ;;  %v543_v19 = vrot.slane %v541_v4, 5  ;;  %v4276_v56 = vld [vmem:[%s4460_s5 + $0xc] sm:$0xff]  }
  0x3b   : > { %3996 = vmatpush3.bf16.xpose.msra.mxu0 %v303_v21  ;;  %v888_v14 = vsel %vm289_vm0, %v3603_v62, 0  ;;  %v741_v16 = vrot.slane %v740_v1, 4  ;;  %v551_v20 = vshll.u32 %v4596_v57, 16  ;;  %v393_v21 = vld [vmem:[%s4460_s5 + $0x24] sm:$0xf]  ;;  %v300_v28 = vsel %vm289_vm0, %v4274_v61, 0 }
  0x3c   : > { %4154 = vmatprep.subr.msk.bf16.mxu0 %vm289_vm0, %v4273_v49  ;;  %4010 = vmatpush3.bf16.xpose.msra.mxu1 %v888_v14  ;;  %v736_v24 = vsel %vm4495_vm3, %v731_v7, %v735_v52  ;;  %v538_v26 = vor.u32 %v537_v11, %v534_v10  ;;  %v547_v27 = vrot.slane %v545_v12, 4  ;;  %v700_v32 = vshrl.u32 %v417_v5, 16  ;;  %v4622_v49 = vld [vmem:[%s4460_s5 + $0x28] sm:$0xf]  ;;  %v414_v1 = vld [vmem:[%s4460_s5 + $0x78] sm:$0xf] }
  0x3d   : > { %v746_v29 = vsel %vm4495_vm3, %v741_v16, %v745_v3  ;;  %v553_v31 = vrot.slane %v551_v20, 5  ;;  %v703_v34 = vshll.u32 %v417_v5, 16  ;;  %v709_v40 = vshll.u32 %v4602_v6, 16  ;;  %v4638_v10 = vld [vmem:[%s4460_s5 + $0x7c] sm:$0xf] }
  0x3e   : > { %v3610_v35 = vcombine.low %v736_v24, %v746_v29  ;;  %v539_v38 = vrot.slane %v538_v26, 4  ;;  %v548_v39 = vor.u32 %v547_v27, %v543_v19  ;;  %v702_v44 = vrot.slane %v700_v32, 4 }
  0x3f   : > { %v705_v45 = vrot.slane %v703_v34, 5  ;;  %v713_v46 = vshrl.u32 %v4602_v6, 16  ;;  %v719_v48 = vshll.u32 %v4607_v13, 16  ;;  %v711_v53 = vrot.slane %v709_v40, 5  ;;  %v4646_v34 = vld [vmem:[%s4460_s5 + $0x80] sm:$0x1] }
  0x40   : > { %4160 = vmatprep.subr.msk.bf16.mxu1 %vm289_vm0, %v3610_v35  ;;  %v544_v51 = vsel %vm4495_vm3, %v539_v38, %v543_v19  ;;  %v549_v52 = vrot.slane %v548_v39, 4  ;;  %v508_v55 = vshrl.u32 %v393_v21, 16  ;;  %v511_v62 = vshll.u32 %v393_v21, 16  ;;  %v4277_v39 = vld [vmem:[%s4460_s5 + $0x60] sm:$0xff]  }
  0x41   : > { %v706_v59 = vor.u32 %v705_v45, %v702_v44  ;;  %v715_v60 = vrot.slane %v713_v46, 4  ;;  %v721_v61 = vrot.slane %v719_v48, 5  ;;  %v517_v5 = vshll.u32 %v4622_v49, 16  ;;  %v390_v46 = vld [vmem:[%s4460_s5 + $0x18] sm:$0xf] }
  0x42   : > { %v554_v3 = vsel %vm4495_vm3, %v549_v52, %v553_v31  ;;  %v510_v4 = vrot.slane %v508_v55, 4  ;;  %v521_v7 = vshrl.u32 %v4622_v49, 16  ;;  %v513_v16 = vrot.slane %v511_v62, 5  ;;  %v4655_v55 = vld [vmem:[%s4460_s5 + $0x1c] sm:$0xf] }
  0x43   : > { %3998 = vmatpush3.bf16.xpose.msra.mxu0 %v300_v28  ;;  %v3602_v11 = vcombine.low %v544_v51, %v554_v3  ;;  %v707_v12 = vrot.slane %v706_v59, 4  ;;  %v716_v14 = vor.u32 %v715_v60, %v711_v53  ;;  %v519_v19 = vrot.slane %v517_v5, 5  ;;  %v4664_v3 = vld [vmem:[%s4460_s5 + $0x20] sm:$0x1] }
  0x44   : > { %4155 = vmatprep.subr.msk.bf16.mxu0 %vm289_vm0, %v4275_v41  ;;  %v523_v20 = vrot.slane %v521_v7, 4  ;;  %v527_v21 = vshll.u32 %v4628_v54, 16  ;;  %v297_v24 = vsel %vm289_vm0, %v4276_v56, 0  ;;  %v514_v29 = vor.u32 %v513_v16, %v510_v4  ;;  %v4278_v7 = vld [vmem:[%s4460_s5] sm:$0xff]  }
  0x45   : > { %v885_v26 = vsel %vm289_vm0, %v3602_v11, 0  ;;  %v712_v27 = vsel %vm4495_vm3, %v707_v12, %v711_v53  ;;  %v717_v28 = vrot.slane %v716_v14, 4  ;;  %v676_v35 = vshrl.u32 %v414_v1, 16 }
  0x46   : > { %4012 = vmatpush3.bf16.xpose.msra.mxu1 %v885_v26  ;;  %v524_v31 = vor.u32 %v523_v20, %v519_v19  ;;  %v529_v32 = vrot.slane %v527_v21, 5  ;;  %v679_v38 = vshll.u32 %v414_v1, 16  ;;  %v515_v41 = vrot.slane %v514_v29, 4  ;;  %v411_v26 = vld [vmem:[%s4460_s5 + $0x6c] sm:$0xf] }
  0x47   : > { %v722_v40 = vsel %vm4495_vm3, %v717_v28, %v721_v61  ;;  %v685_v44 = vshll.u32 %v4638_v10, 16  ;;  %v689_v45 = vshrl.u32 %v4638_v10, 16  ;;  %v678_v52 = vrot.slane %v676_v35, 4 }
  0x48   : > { %v3609_v48 = vcombine.low %v712_v27, %v722_v40  ;;  %v525_v51 = vrot.slane %v524_v31, 4  ;;  %v681_v53 = vrot.slane %v679_v38, 5  ;;  %v520_v56 = vsel %vm4495_vm3, %v515_v41, %v519_v19  ;;  %v4680_v41 = vld [vmem:[%s4460_s5 + $0x74] sm:$0x1] }
  0x49   : > { %v687_v59 = vrot.slane %v685_v44, 5  ;;  %v691_v60 = vrot.slane %v689_v45, 4  ;;  %v695_v61 = vshll.u32 %v4646_v34, 16  ;;  %v484_v4 = vshrl.u32 %v390_v46, 16 }
  0x4a   : > { %4161 = vmatprep.subr.msk.bf16.mxu1 %vm289_vm0, %v3609_v48  ;;  %v530_v62 = vsel %vm4495_vm3, %v525_v51, %v529_v32  ;;  %v682_v1 = vor.u32 %v681_v53, %v678_v52  ;;  %v487_v5 = vshll.u32 %v390_v46, 16  ;;  %v493_v16 = vshll.u32 %v4655_v55, 16  ;;  %v4674_v32 = vld [vmem:[%s4460_s5 + $0x70] sm:$0xf]  ;;  %v387_v51 = vld [vmem:[%s4460_s5 + $0xc] sm:$0xf] }
  0x4b   : > { %4000 = vmatpush3.bf16.xpose.msra.mxu0 %v297_v24  ;;  %v3601_v11 = vcombine.low %v520_v56, %v530_v62  ;;  %v692_v12 = vor.u32 %v691_v60, %v687_v59  ;;  %v697_v14 = vrot.slane %v695_v61, 5  ;;  %v486_v20 = vrot.slane %v484_v4, 4  ;;  %v4687_v60 = vld [vmem:[%s4460_s5 + $0x10] sm:$0xf] }
  0x4c   : > { %4156 = vmatprep.subr.msk.bf16.mxu0 %vm289_vm0, %v4277_v39  ;;  %v683_v19 = vrot.slane %v682_v1, 4  ;;  %v489_v21 = vrot.slane %v487_v5, 5  ;;  %v497_v24 = vshrl.u32 %v4655_v55, 16  ;;  %v495_v29 = vrot.slane %v493_v16, 5  ;;  %v4692_v5 = vld [vmem:[%s4460_s5 + $0x14] sm:$0x1] }
  0x4d   : > { %v882_v27 = vsel %vm289_vm0, %v3601_v11, 0  ;;  %v693_v28 = vrot.slane %v692_v12, 4  ;;  %v503_v31 = vshll.u32 %v4664_v3, 16  ;;  %v294_v40 = vsel %vm289_vm0, %v4278_v7, 0  ;;  %v978_v7 = vld [vmem:[%s4460_s5 + $0xb4] sm:$0xe] }
  0x4e   : > { %4014 = vmatpush3.bf16.xpose.msra.mxu1 %v882_v27  ;;  %v688_v35 = vsel %vm4495_vm3, %v683_v19, %v687_v59  ;;  %v490_v38 = vor.u32 %v489_v21, %v486_v20  ;;  %v499_v39 = vrot.slane %v497_v24, 4  ;;  %v652_v46 = vshrl.u32 %v411_v26, 16 }
  0x4f   : > { %v698_v44 = vsel %vm4495_vm3, %v693_v28, %v697_v14  ;;  %v505_v45 = vrot.slane %v503_v31, 5  ;;  %v655_v48 = vshll.u32 %v411_v26, 16  ;;  %v661_v59 = vshll.u32 %v4674_v32, 16 }
  0x50   : > { %v3608_v52 = vcombine.low %v688_v35, %v698_v44  ;;  %v491_v53 = vrot.slane %v490_v38, 4  ;;  %v500_v56 = vor.u32 %v499_v39, %v495_v29  ;;  %v654_v61 = vrot.slane %v652_v46, 4  ;;  %v408_v44 = vld [vmem:[%s4460_s5 + $0x60] sm:$0xf]  ;;  %v4710_v46 = vld [vmem:[%s4460_s5 + $0x64] sm:$0xf] }
  0x51   : > { %v657_v62 = vrot.slane %v655_v48, 5  ;;  %v665_v1 = vshrl.u32 %v4674_v32, 16  ;;  %v671_v4 = vshll.u32 %v4680_v41, 16  ;;  %v663_v14 = vrot.slane %v661_v59, 5 }
  0x52   : > { %4162 = vmatprep.subr.msk.bf16.mxu1 %vm289_vm0, %v3608_v52  ;;  %v496_v11 = vsel %vm4495_vm3, %v491_v53, %v495_v29  ;;  %v501_v12 = vrot.slane %v500_v56, 4  ;;  %v460_v16 = vshrl.u32 %v387_v51, 16  ;;  %v463_v24 = vshll.u32 %v387_v51, 16 }
  0x53   : > { %4002 = vmatpush3.bf16.xpose.msra.mxu0 %v294_v40  ;;  %v658_v19 = vor.u32 %v657_v62, %v654_v61  ;;  %v667_v20 = vrot.slane %v665_v1, 4  ;;  %v673_v21 = vrot.slane %v671_v4, 5  ;;  %v469_v28 = vshll.u32 %v4687_v60, 16  ;;  %v4717_v62 = vld [vmem:[%s4460_s5 + $0x68] sm:$0x1] }
  0x54   : > { %v506_v26 = vsel %vm4495_vm3, %v501_v12, %v505_v45  ;;  %v462_v27 = vrot.slane %v460_v16, 4  ;;  %v473_v31 = vshrl.u32 %v4687_v60, 16  ;;  %v465_v39 = vrot.slane %v463_v24, 5  ;;  %v970_v12 = vld [vmem:[%s4460_s5 + $0x54] sm:$0xe] }
  0x55   : > { %v3600_v35 = vcombine.low %v496_v11, %v506_v26  ;;  %v659_v29 = vrot.slane %v658_v19, 4  ;;  %v668_v38 = vor.u32 %v667_v20, %v663_v14  ;;  %v471_v45 = vrot.slane %v469_v28, 5  ;;  %v384_v24 = vld [vmem:[%s4460_s5] sm:$0xf] }
  0x56   : > { %v475_v48 = vrot.slane %v473_v31, 4  ;;  %v479_v51 = vshll.u32 %v4692_v5, 16  ;;  %v3630_v52 = vrot.slane %v978_v7, 9  ;;  %v466_v61 = vor.u32 %v465_v39, %v462_v27 }
  0x57   : > { %v879_v53 = vsel %vm289_vm0, %v3600_v35, 0  ;;  %v664_v56 = vsel %vm4495_vm3, %v659_v29, %v663_v14  ;;  %v669_v59 = vrot.slane %v668_v38, 4  ;;  %v1139_v11 = vrot.slane %v1137_v17, 4  ;;  %v4744_v38 = vld [vmem:[%s4460_s5 + $0x4] sm:$0xf] }
  0x58   : > { %4016 = vmatpush3.bf16.xpose.msra.mxu1 %v879_v53  ;;  %v476_v1 = vor.u32 %v475_v48, %v471_v45  ;;  %v481_v4 = vrot.slane %v479_v51, 5  ;;  %v1138_v7 = vsel %vm4704_vm6, %v3630_v52, %v1137_v17  ;;  %v467_v16 = vrot.slane %v466_v61, 4  ;;  %v4749_v51 = vld [vmem:[%s4460_s5 + $0x8] sm:$0x1]  ;;  %v977_v61 = vld [vmem:[%s4460_s5 + $0xa8] sm:$0xe] }
  0x59   : > { %v674_v14 = vsel %vm4495_vm3, %v669_v59, %v673_v21  ;;  %v628_v19 = vshrl.u32 %v408_v44, 16  ;;  %v631_v20 = vshll.u32 %v408_v44, 16  ;;  %v637_v28 = vshll.u32 %v4710_v46, 16 }
  0x5a   : > { %4004 = vmatmul.mubr.msk.bf16.vlgmr.msra.gmra.mxu0 %vm289_vm0, %v4448_v0  ;;  %v3607_v26 = vcombine.low %v664_v56, %v674_v14  ;;  %v477_v27 = vrot.slane %v476_v1, 4  ;;  %v1141_v0 = vsel %vm4704_vm6, %v1139_v11, %v1140_v25  ;;  %v472_v8 = vsel %vm4495_vm3, %v467_v16, %v471_v45 }
  0x5b   : > { %v3647_v17 = vcombine.low %v1138_v7, %v1141_v0  ;;  %v630_v21 = vrot.slane %v628_v19, 4  ;;  %v633_v31 = vrot.slane %v631_v20, 5  ;;  %v639_v29 = vrot.slane %v637_v28, 5  ;;  %v4280_v0 = vld [vmem:[%s4460_s5 + $0x60] sm:$0xff]  }
  0x5c   : > { %4163 = vmatprep.subr.msk.bf16.mxu1 %vm289_vm0, %v3607_v26  ;;  %v482_v35 = vsel %vm4495_vm3, %v477_v27, %v481_v4  ;;  %v641_v9 = vshrl.u32 %v4710_v46, 16  ;;  %v647_v25 = vshll.u32 %v4717_v62, 16  ;;  %v3622_v45 = vrot.slane %v970_v12, 9  ;;  %v969_v27 = vld [vmem:[%s4460_s5 + $0x48] sm:$0xe] }
  0x5d   : > { %v3599_v39 = vcombine.low %v472_v8, %v482_v35  ;;  %4165 = vmatprep.subr.msk.bf16.mxu0 %vm289_vm0, %v3647_v17  ;;  %v634_v44 = vor.u32 %v633_v31, %v630_v21  ;;  %v1081_v48 = vrot.slane %v4483_v18, 5  ;;  %v436_v56 = vshrl.u32 %v384_v24, 16  ;;  %v976_v31 = vld [vmem:[%s4460_s5 + $0x9c] sm:$0xe] }
  0x5e   : > { %v643_v52 = vrot.slane %v641_v9, 4  ;;  %v649_v53 = vrot.slane %v647_v25, 5  ;;  %v439_v59 = vshll.u32 %v384_v24, 16  ;;  %v445_v16 = vshll.u32 %v4744_v38, 16 }
  0x5f   : > { %v876_v1 = vsel %vm289_vm0, %v3599_v39, 0  ;;  %v635_v4 = vrot.slane %v634_v44, 4  ;;  %v1082_v7 = vsel %vm4704_vm6, %v3622_v45, %v1081_v48  ;;  %v1083_v11 = vrot.slane %v1081_v48, 4 }
  0x60   : > { %4018 = vmatpush3.bf16.xpose.msra.mxu1 %v876_v1  ;;  %v644_v12 = vor.u32 %v643_v52, %v639_v29  ;;  %v438_v18 = vrot.slane %v436_v56, 4  ;;  %v441_v14 = vrot.slane %v439_v59, 5  ;;  %v449_v24 = vshrl.u32 %v4744_v38, 16  ;;  %v968_v59 = vld [vmem:[%s4460_s5 + $0x3c] sm:$0xe] }
  0x61   : > { %v640_v19 = vsel %vm4495_vm3, %v635_v4, %v639_v29  ;;  %v1085_v20 = vsel %vm4704_vm6, %v1083_v11, %v1084_v42  ;;  %v455_v26 = vshll.u32 %v4749_v51, 16  ;;  %v447_v21 = vrot.slane %v445_v16, 5 }
  0x62   : > { %v645_v28 = vrot.slane %v644_v12, 4  ;;  %v3639_v8 = vcombine.low %v1082_v7, %v1085_v20  ;;  %v442_v17 = vor.u32 %v441_v14, %v438_v18  ;;  %v451_v35 = vrot.slane %v449_v24, 4  ;;  %v4282_v12 = vld [vmem:[%s4460_s5 + $0x54] sm:$0xff]  }
  0x63   : > { %v457_v9 = vrot.slane %v455_v26, 5  ;;  %v3629_v29 = vrot.slane %v977_v61, 9  ;;  %v1130_v22 = vrot.slane %v4504_v47, 5  ;;  %v1133_v44 = vrot.slane %v4510_v50, 5 }
  0x64   : > { %v650_v42 = vsel %vm4495_vm3, %v645_v28, %v649_v53  ;;  %v1217_v25 = vsel %vm289_vm0, %v3639_v8, 0  ;;  %v443_v39 = vrot.slane %v442_v17, 4  ;;  %v452_v48 = vor.u32 %v451_v35, %v447_v21  ;;  %v967_v17 = vld [vmem:[%s4460_s5 + $0x30] sm:$0xe] }
  0x65   : > { %v3606_v45 = vcombine.low %v640_v19, %v650_v42  ;;  %4024 = vmatpush3.bf16.xpose.msra.mxu0 %v1217_v25  ;;  %v1131_v52 = vsel %vm4704_vm6, %v3629_v29, %v1130_v22  ;;  %v1132_v56 = vrot.slane %v1130_v22, 4  ;;  %v3621_v61 = vrot.slane %v969_v27, 9  ;;  %v4279_v19 = vld [vmem:[%s4460_s5 + $0xc0] sm:$0xff]   ;;  %v975_v27 = vld [vmem:[%s4460_s5 + $0x90] sm:$0xe] }
  0x66   : > { %v448_v47 = vsel %vm4495_vm3, %v443_v39, %v447_v21  ;;  %v1074_v53 = vrot.slane %v4518_v58, 5  ;;  %v1077_v1 = vrot.slane %v4521_v63, 5  ;;  %v453_v50 = vrot.slane %v452_v48, 4  ;;  %v4284_v21 = vld [vmem:[%s4460_s5 + $0x48] sm:$0xff]  }
  0x67   : > { %4164 = vmatprep.subr.msk.bf16.mxu1 %vm289_vm0, %v3606_v45  ;;  %v1134_v4 = vsel %vm4704_vm6, %v1132_v56, %v1133_v44  ;;  %v4783_v7 = vsel %vm289_vm0, %v4280_v0, 0  ;;  %v3628_v11 = vrot.slane %v976_v31, 9  ;;  %v1123_v63 = vrot.slane %v4537_v30, 5  ;;  %v974_v45 = vld [vmem:[%s4460_s5 + $0x84] sm:$0xe] }
  0x68   : > { %v3646_v18 = vcombine.low %v1131_v52, %v1134_v4  ;;  %v1075_v58 = vsel %vm4704_vm6, %v3621_v61, %v1074_v53  ;;  %v1076_v14 = vrot.slane %v1074_v53, 4  ;;  %v458_v16 = vsel %vm4495_vm3, %v453_v50, %v457_v9  ;;  %v4819_v48 = vld [vmem:[%s5960_s1 + $0x8] sm:$0xf]  ;;  %v966_v61 = vld [vmem:[%s4460_s5 + $0x24] sm:$0xe]  ;;  %v4286_v4 = vld [vmem:[%s4460_s5 + $0x3c] sm:$0xff]  }
  0x69   : > { %v1126_v20 = vrot.slane %v4544_v36, 5  ;;  %v3620_v24 = vrot.slane %v968_v59, 9  ;;  %v1067_v26 = vrot.slane %v4550_v43, 5  ;;  %v3598_v0 = vcombine.low %v448_v47, %v458_v16  ;;  %4039 = vmatprep.mubr.msk.bf16.mxu0 %vm289_vm0, %v4819_v48  ;;  %v4281_v16 = vld [vmem:[%s4460_s5 + $0xb4] sm:$0xff]  }
  0x6a   : > { %4166 = vmatprep.subr.msk.bf16.mxu0 %vm289_vm0, %v3646_v18  ;;  %v1078_v28 = vsel %vm4704_vm6, %v1076_v14, %v1077_v1  ;;  %v1124_v8 = vsel %vm4704_vm6, %v3628_v11, %v1123_v63  ;;  %v1125_v30 = vrot.slane %v1123_v63, 4  ;;  %v1070_v43 = vrot.slane %v4561_v2, 5  ;;  %v973_v11 = vld [vmem:[%s4460_s5 + $0x78] sm:$0xe] }
  0x6b   : > { %v3638_v31 = vcombine.low %v1075_v58, %v1078_v28  ;;  %v1068_v36 = vsel %vm4704_vm6, %v3620_v24, %v1067_v26  ;;  %v1069_v35 = vrot.slane %v1067_v26, 4  ;;  %v873_v9 = vsel %vm289_vm0, %v3598_v0, 0  ;;  %v4288_v0 = vld [vmem:[%s4460_s5 + $0x30] sm:$0xff]  }
  0x6c   : > { %v1127_v29 = vsel %vm4704_vm6, %v1125_v30, %v1126_v20  ;;  %v4809_v22 = vsel %vm289_vm0, %v4282_v12, 0  ;;  %v3627_v42 = vrot.slane %v975_v27, 9  ;;  %4020 = vmatpush3.bf16.xpose.msra.mxu1 %v873_v9  ;;  %v1116_v2 = vrot.slane %v4569_v15, 5  ;;  %v965_v27 = vld [vmem:[%s4460_s5 + $0x18] sm:$0xe] }
  0x6d   : > { %v1214_v25 = vsel %vm289_vm0, %v3638_v31, 0  ;;  %v3645_v39 = vcombine.low %v1124_v8, %v1127_v29  ;;  %v1071_v44 = vsel %vm4704_vm6, %v1069_v35, %v1070_v43  ;;  %4173 = vmatprep.subr.msk.bf16.mxu1 %vm289_vm0, %v4279_v19  ;;  %v1119_v56 = vrot.slane %v4575_v23, 5  ;;  %v972_v30 = vld [vmem:[%s4460_s5 + $0x6c] sm:$0xe] }
  0x6e   : > { %4026 = vmatpush3.bf16.xpose.msra.mxu0 %v1214_v25  ;;  %v3637_v52 = vcombine.low %v1068_v36, %v1071_v44  ;;  %v3619_v59 = vrot.slane %v967_v17, 9  ;;  %v1060_v47 = vrot.slane %v4582_v37, 5  ;;  %v1117_v15 = vsel %vm4704_vm6, %v3627_v42, %v1116_v2  ;;  %v4311_v17 = vld [vmem:[%s5960_s1 + $0x4] sm:$0xf]  ;;  %v4873_v29 = vld [vmem:[%s5960_s1 + $0xc] sm:$0xf] }
  0x6f   : > { %4167 = vmatprep.subr.msk.bf16.mxu0 %vm289_vm0, %v3645_v39  ;;  %v1118_v53 = vrot.slane %v1116_v2, 4  ;;  %v1063_v1 = vrot.slane %v4596_v57, 5  ;;  %v4830_v50 = vsel %vm289_vm0, %v4284_v21, 0  ;;  %v3626_v18 = vrot.slane %v974_v45, 9  ;;  %v964_v45 = vld [vmem:[%s4460_s5 + $0xc] sm:$0xe] }
  0x70   : > { %v1211_v23 = vsel %vm289_vm0, %v3637_v52, 0  ;;  %v1061_v37 = vsel %vm4704_vm6, %v3619_v59, %v1060_v47  ;;  %v1062_v12 = vrot.slane %v1060_v47, 4  ;;  %v1109_v58 = vrot.slane %v4602_v6, 5  ;;  %v4290_v52 = vld [vmem:[%s4460_s5 + $0x24] sm:$0xff]  }
  0x71   : > { %v1120_v57 = vsel %vm4704_vm6, %v1118_v53, %v1119_v56  ;;  %v1112_v14 = vrot.slane %v4607_v13, 5  ;;  %v3618_v63 = vrot.slane %v966_v61, 9  ;;  %v1053_v24 = vrot.slane %v4622_v49, 5 }
  0x72   : > { %v3644_v19 = vcombine.low %v1117_v15, %v1120_v57  ;;  %v1064_v20 = vsel %vm4704_vm6, %v1062_v12, %v1063_v1  ;;  %v1056_v26 = vrot.slane %v4628_v54, 5  ;;  %v4852_v8 = vsel %vm4704_vm6, %v3626_v18, %v1109_v58 }
  0x73   : > { %v3636_v28 = vcombine.low %v1061_v37, %v1064_v20  ;;  %v1111_v6 = vrot.slane %v1109_v58, 4  ;;  %v4855_v13 = vsel %vm289_vm0, %v4286_v4, 0  ;;  %4022 = vmatmul.mubr.msk.bf16.vlgmr.msra.gmra.mxu1 %vm289_vm0, %v4311_v17  ;;  %v1054_v49 = vsel %vm4704_vm6, %v3618_v63, %v1053_v24  ;;  %v4283_v4 = vld [vmem:[%s4460_s5 + $0xa8] sm:$0xff]   ;;  %v963_v37 = vld [vmem:[%s4460_s5] sm:$0xe] }
  0x74   : > { %v1055_v54 = vrot.slane %v1053_v24, 4  ;;  %v3625_v21 = vrot.slane %v973_v11, 9  ;;  %v1102_v31 = vrot.slane %v4638_v10, 5  ;;  %4042 = vmatpush3.bf16.xpose.msra.mxu1 %v4783_v7  ;;  %v1105_v43 = vrot.slane %v4646_v34, 5  ;;  %4057 = vmatprep.mubr.msk.bf16.mxu1 %vm289_vm0, %v4873_v29 }
  0x75   : > { %v1208_v36 = vsel %vm289_vm0, %v3636_v28, 0  ;;  %v1113_v35 = vsel %vm4704_vm6, %v1111_v6, %v1112_v14  ;;  %v3617_v9 = vrot.slane %v965_v27, 9  ;;  %4174 = vmatprep.subr.msk.bf16.mxu1 %vm289_vm0, %v4281_v16  ;;  %v1046_v39 = vrot.slane %v4655_v55, 5  ;;  %v4292_v14 = vld [vmem:[%s4460_s5 + $0x18] sm:$0xff]   ;;  %v3744_v27 = vld [vmem:[%s4460_s5 + $0xc0] sm:$0xf] }
  0x76   : > { %4028 = vmatpush3.bf16.xpose.msra.mxu0 %v1211_v23  ;;  %v3643_v10 = vcombine.low %v4852_v8, %v1113_v35  ;;  %v1057_v7 = vsel %vm4704_vm6, %v1055_v54, %v1056_v26  ;;  %v4881_v42 = vsel %vm4704_vm6, %v3625_v21, %v1102_v31  ;;  %v1104_v34 = vrot.slane %v1102_v31, 4  ;;  %v3720_v31 = vld [vmem:[%s4460_s5 + $0x60] sm:$0xf] }
  0x77   : > { %4168 = vmatprep.subr.msk.bf16.mxu0 %vm289_vm0, %v3644_v19  ;;  %v3635_v25 = vcombine.low %v1054_v49, %v1057_v7  ;;  %v1049_v44 = vrot.slane %v4664_v3, 5  ;;  %v4887_v2 = vsel %vm289_vm0, %v4288_v0, 0  ;;  %v3624_v59 = vrot.slane %v972_v30, 9  ;;  %v971_v3 = vld [vmem:[%s4460_s5 + $0x60] sm:$0xe] }
  0x78   : > { %v4895_v56 = vsel %vm4704_vm6, %v1104_v34, %v1105_v43  ;;  %v1095_v47 = vrot.slane %v4674_v32, 5  ;;  %v1098_v55 = vrot.slane %v4680_v41, 5  ;;  %v1047_v53 = vsel %vm4704_vm6, %v3617_v9, %v1046_v39  ;;  %v4953_v49 = vld [vmem:[%s4460_s5 + $0xc8] sm:$0x1]  ;;  %v4285_v7 = vld [vmem:[%s4460_s5 + $0x9c] sm:$0xff]  }
  0x79   : > { %v4901_v61 = vsel %vm289_vm0, %v3635_v25, 0  ;;  %v3642_v15 = vcombine.low %v4881_v42, %v4895_v56  ;;  %v1048_v1 = vrot.slane %v1046_v39, 4  ;;  %v3616_v23 = vrot.slane %v964_v45, 9 }
  0x7a   : > { %v4910_v11 = vsel %vm4704_vm6, %v3624_v59, %v1095_v47  ;;  %v1097_v32 = vrot.slane %v1095_v47, 4  ;;  %v1039_v41 = vrot.slane %v4687_v60, 5  ;;  %v1042_v18 = vrot.slane %v4692_v5, 5 }
  0x7b   : > { %v1050_v12 = vsel %vm4704_vm6, %v1048_v1, %v1049_v44  ;;  %v4918_v57 = vsel %vm289_vm0, %v4290_v52, 0  ;;  %v3623_v58 = vrot.slane %v971_v3, 9  ;;  %v1088_v20 = vrot.slane %v4710_v46, 5  ;;  %v4942_v46 = vld [vmem:[%s4460_s5 + $0xc4] sm:$0xf] }
  0x7c   : > { %v3634_v63 = vcombine.low %v1047_v53, %v1050_v12  ;;  %v4923_v16 = vsel %vm4704_vm6, %v1097_v32, %v1098_v55  ;;  %v1040_v60 = vsel %vm4704_vm6, %v3616_v23, %v1039_v41  ;;  %v1041_v19 = vrot.slane %v1039_v41, 4  ;;  %4044 = vmatpush3.bf16.xpose.msra.mxu1 %v4809_v22  ;;  %v4294_v55 = vld [vmem:[%s4460_s5 + $0xc] sm:$0xff]   ;;  %v4978_v53 = vld [vmem:[%s4460_s5 + $0x68] sm:$0x1] }
  0x7d   : > { %v3641_v5 = vcombine.low %v4910_v11, %v4923_v16  ;;  %v1091_v24 = vrot.slane %v4717_v62, 5  ;;  %v3615_v26 = vrot.slane %v963_v37, 9  ;;  %4175 = vmatprep.subr.msk.bf16.mxu1 %vm289_vm0, %v4283_v4  ;;  %v1032_v28 = vrot.slane %v4744_v38, 5 }
  0x7e   : > { %4030 = vmatpush3.bf16.xpose.msra.mxu0 %v1208_v36  ;;  %v4935_v0 = vsel %vm289_vm0, %v3634_v63, 0  ;;  %v1043_v22 = vsel %vm4704_vm6, %v1041_v19, %v1042_v18  ;;  %v1035_v8 = vrot.slane %v4749_v51, 5  ;;  %v4947_v6 = vsel %vm4704_vm6, %v3623_v58, %v1088_v20  ;;  %v3741_v18 = vld [vmem:[%s4460_s5 + $0xb4] sm:$0xf] }
  0x7f   : > { %4169 = vmatprep.subr.msk.bf16.mxu0 %vm289_vm0, %v3643_v10  ;;  %v3633_v62 = vcombine.low %v1040_v60, %v1043_v22  ;;  %v1090_v30 = vrot.slane %v1088_v20, 4  ;;  %v4950_v17 = vsel %vm289_vm0, %v4292_v14, 0  ;;  %v1033_v38 = vsel %vm4704_vm6, %v3615_v26, %v1032_v28  ;;  %v4968_v10 = vld [vmem:[%s4460_s5 + $0x64] sm:$0xf]  ;;  %v5001_v26 = vld [vmem:[%s4460_s5 + $0xb8] sm:$0xf] }
  0x80   : > { %v1034_v51 = vrot.slane %v1032_v28, 4  ;;  %v1904_v54 = vshrl.u32 %v3744_v27, 16  ;;  %v1907_v21 = vshll.u32 %v3744_v27, 16  ;;  %v1913_v43 = vshll.u32 %v4942_v46, 16  ;;  %v5006_v28 = vld [vmem:[%s4460_s5 + $0xbc] sm:$0x1] }
  0x81   : > { %v4959_v36 = vsel %vm289_vm0, %v3633_v62, 0  ;;  %v4963_v35 = vsel %vm4704_vm6, %v1090_v30, %v1091_v24  ;;  %v1917_v9 = vshrl.u32 %v4942_v46, 16  ;;  %v1923_v47 = vshll.u32 %v4953_v49, 16 }
  0x82   : > { %v3640_v34 = vcombine.low %v4947_v6, %v4963_v35  ;;  %v1036_v25 = vsel %vm4704_vm6, %v1034_v51, %v1035_v8  ;;  %v1906_v39 = vrot.slane %v1904_v54, 4  ;;  %v1909_v44 = vrot.slane %v1907_v21, 5  ;;  %v4287_v51 = vld [vmem:[%s4460_s5 + $0x90] sm:$0xff]  }
  0x83   : > { %v3632_v45 = vcombine.low %v1033_v38, %v1036_v25  ;;  %v1915_v52 = vrot.slane %v1913_v43, 5  ;;  %v1919_v59 = vrot.slane %v1917_v9, 4  ;;  %v1712_v1 = vshrl.u32 %v3720_v31, 16  ;;  %v3717_v38 = vld [vmem:[%s4460_s5 + $0x54] sm:$0xf] }
  0x84   : > { %v1910_v3 = vor.u32 %v1909_v44, %v1906_v39  ;;  %v1715_v4 = vshll.u32 %v3720_v31, 16  ;;  %v1721_v32 = vshll.u32 %v4968_v10, 16  ;;  %4046 = vmatpush3.bf16.xpose.msra.mxu1 %v4830_v50  ;;  %v1925_v37 = vrot.slane %v1923_v47, 5  ;;  %v170_v50 = vld [vmem:[%s5961_s2] sm:$0xff]  ;;  %v5018_v44 = vld [vmem:[%s4460_s5 + $0x58] sm:$0xf] }
  0x85   : > { %v4983_v23 = vsel %vm289_vm0, %v3632_v45, 0  ;;  %v1920_v41 = vor.u32 %v1919_v59, %v1915_v52  ;;  %v1725_v12 = vshrl.u32 %v4968_v10, 16  ;;  %4176 = vmatprep.subr.msk.bf16.mxu1 %vm289_vm0, %v4285_v7  ;;  %v1714_v14 = vrot.slane %v1712_v1, 4  ;;  %v5023_v59 = vld [vmem:[%s4460_s5 + $0x5c] sm:$0x1] }
  0x86   : > { %4032 = vmatpush3.bf16.xpose.msra.mxu0 %v4901_v61  ;;  %v1911_v58 = vrot.slane %v1910_v3, 4  ;;  %v1717_v63 = vrot.slane %v1715_v4, 5  ;;  %v1723_v60 = vrot.slane %v1721_v32, 5  ;;  %v1731_v61 = vshll.u32 %v4978_v53, 16 }
  0x87   : > { %4170 = vmatprep.subr.msk.bf16.mxu0 %vm289_vm0, %v3642_v15  ;;  %v1921_v19 = vrot.slane %v1920_v41, 4  ;;  %v1727_v20 = vrot.slane %v1725_v12, 4  ;;  %v4998_v24 = vsel %vm289_vm0, %v4294_v55, 0  ;;  %v1880_v42 = vshrl.u32 %v3741_v18, 16  ;;  %v3780_v41 = vld [vmem:[%s4460_s5 + $0xc0] sm:$0xe] }
  0x88   : > { %v1916_v27 = vsel %vm4495_vm3, %v1911_v58, %v1915_v52  ;;  %v1718_v22 = vor.u32 %v1717_v63, %v1714_v14  ;;  %v1733_v8 = vrot.slane %v1731_v61, 5  ;;  %v4374_v62 = vmov 0  }
  0x89   : > { %v1926_v56 = vsel %vm4495_vm3, %v1921_v19, %v1925_v37  ;;  %v1728_v15 = vor.u32 %v1727_v20, %v1723_v60  ;;  %4262 = vset.pattern.permute.xlu0 %v4374_v62  ;;  %v1883_v30 = vshll.u32 %v3741_v18, 16  ;;  %v1882_v31 = vrot.slane %v1880_v42, 4  ;;  %v3738_v62 = vld [vmem:[%s4460_s5 + $0xa8] sm:$0xf] }
  0x8a   : > { %v5012_v54 = vcombine.low %v1916_v27, %v1926_v56  ;;  %v1719_v21 = vrot.slane %v1718_v22, 4  ;;  %173 = vperm.xlu0 %4262, %v170_v50   ;;  %v1889_v43 = vshll.u32 %v5001_v26, 16  ;;  %v1893_v25 = vshrl.u32 %v5001_v26, 16  ;;  %v4289_v27 = vld [vmem:[%s4460_s5 + $0x84] sm:$0xff]  }
  0x8b   : > { %v1729_v9 = vrot.slane %v1728_v15, 4  ;;  %v1885_v7 = vrot.slane %v1883_v30, 5  ;;  %v1899_v39 = vshll.u32 %v5006_v28, 16  ;;  %v1688_v47 = vshrl.u32 %v3717_v38, 16 }
  0x8c   : > { %v1724_v45 = vsel %vm4495_vm3, %v1719_v21, %v1723_v60  ;;  %v1891_v52 = vrot.slane %v1889_v43, 5  ;;  %v1691_v55 = vshll.u32 %v3717_v38, 16  ;;  %4048 = vmatpush3.bf16.xpose.msra.mxu1 %v4855_v13  ;;  %v1895_v4 = vrot.slane %v1893_v25, 4  ;;  %v3772_v60 = vld [vmem:[%s4460_s5 + $0x60] sm:$0xe] }
  0x8d   : > { %v1734_v3 = vsel %vm4495_vm3, %v1729_v9, %v1733_v8  ;;  %v1886_v1 = vor.u32 %v1885_v7, %v1882_v31  ;;  %v1901_v32 = vrot.slane %v1899_v39, 5  ;;  %4177 = vmatprep.subr.msk.bf16.mxu1 %vm289_vm0, %v4287_v51  ;;  %v1690_v12 = vrot.slane %v1688_v47, 4  ;;  %v5053_v31 = vld [vmem:[%s4460_s5 + $0xac] sm:$0xf]  ;;  %v5067_v25 = vld [vmem:[%s4460_s5 + $0xb0] sm:$0x1] }
  0x8e   : > { %4034 = vmatpush3.bf16.xpose.msra.mxu0 %v4935_v0  ;;  %v3755_v37 = vcombine.low %v1724_v45, %v1734_v3  ;;  %v1693_v18 = vrot.slane %v1691_v55, 5  ;;  %v1697_v58 = vshll.u32 %v5018_v44, 16  ;;  %v1896_v14 = vor.u32 %v1895_v4, %v1891_v52  ;;  %v3714_v55 = vld [vmem:[%s4460_s5 + $0x48] sm:$0xf] }
  0x8f   : > { %4171 = vmatprep.subr.msk.bf16.mxu0 %vm289_vm0, %v3641_v5  ;;  %v1887_v13 = vrot.slane %v1886_v1, 4  ;;  %v1701_v63 = vshrl.u32 %v5018_v44, 16  ;;  %v1707_v0 = vshll.u32 %v5023_v59, 16  ;;  %v3796_v61 = vrot.slane %v3780_v41, 9 }
  0x90   : > { %v5040_v50 = vsel %vm289_vm0, %v3755_v37, 0  ;;  %v1694_v19 = vor.u32 %v1693_v18, %v1690_v12  ;;  %v1699_v20 = vrot.slane %v1697_v58, 5  ;;  %v1897_v16 = vrot.slane %v1896_v14, 4  ;;  %v5093_v18 = vld [vmem:[%s4460_s5 + $0x50] sm:$0x1]  ;;  %v4291_v14 = vld [vmem:[%s4460_s5 + $0x78] sm:$0xff]  }
  0x91   : > { %v1892_v11 = vsel %vm4495_vm3, %v1887_v13, %v1891_v52  ;;  %v1703_v5 = vrot.slane %v1701_v63, 4  ;;  %v1709_v22 = vrot.slane %v1707_v0, 5  ;;  %v2242_v56 = vrot.slane %v4942_v46, 5 }
  0x92   : > { %v1695_v42 = vrot.slane %v1694_v19, 4  ;;  %v2245_v15 = vrot.slane %v4953_v49, 5  ;;  %v3788_v8 = vrot.slane %v3772_v60, 9  ;;  %v1902_v30 = vsel %vm4495_vm3, %v1897_v16, %v1901_v32  ;;  %v5089_v32 = vld [vmem:[%s4460_s5 + $0x4c] sm:$0xf] }
  0x93   : > { %v1704_v38 = vor.u32 %v1703_v5, %v1699_v20  ;;  %v2186_v51 = vrot.slane %v4968_v10, 5  ;;  %v2189_v21 = vrot.slane %v4978_v53, 5  ;;  %v5055_v43 = vcombine.low %v1892_v11, %v1902_v30 }
  0x94   : > { %v1700_v46 = vsel %vm4495_vm3, %v1695_v42, %v1699_v20  ;;  %v5061_v49 = vsel %vm4704_vm6, %v3796_v61, %v2242_v56  ;;  %v2244_v9 = vrot.slane %v2242_v56, 4  ;;  %4050 = vmatpush3.bf16.xpose.msra.mxu1 %v4887_v2  ;;  %v1856_v39 = vshrl.u32 %v3738_v62, 16  ;;  %v3779_v20 = vld [vmem:[%s4460_s5 + $0xb4] sm:$0xe] }
  0x95   : > { %v1705_v7 = vrot.slane %v1704_v38, 4  ;;  %v2187_v10 = vsel %vm4704_vm6, %v3788_v8, %v2186_v51  ;;  %v2188_v53 = vrot.slane %v2186_v51, 4  ;;  %4178 = vmatprep.subr.msk.bf16.mxu1 %vm289_vm0, %v4289_v27  ;;  %v1859_v52 = vshll.u32 %v3738_v62, 16  ;;  %v3771_v38 = vld [vmem:[%s4460_s5 + $0x54] sm:$0xe] }
  0x96   : > { %4036 = vmatpush3.bf16.xpose.msra.mxu0 %v4959_v36  ;;  %v5073_v45 = vsel %vm4704_vm6, %v2244_v9, %v2245_v15  ;;  %v1865_v2 = vshll.u32 %v5053_v31, 16  ;;  %v1869_v47 = vshrl.u32 %v5053_v31, 16  ;;  %v1858_v4 = vrot.slane %v1856_v39, 4  ;;  %v3735_v9 = vld [vmem:[%s4460_s5 + $0x9c] sm:$0xf]  ;;  %v4293_v39 = vld [vmem:[%s4460_s5 + $0x6c] sm:$0xff]  }
  0x97   : > { %4172 = vmatprep.subr.msk.bf16.mxu0 %vm289_vm0, %v3640_v34  ;;  %v1710_v36 = vsel %vm4495_vm3, %v1705_v7, %v1709_v22  ;;  %v3813_v3 = vcombine.low %v5061_v49, %v5073_v45  ;;  %v2190_v1 = vsel %vm4704_vm6, %v2188_v53, %v2189_v21  ;;  %v1861_v12 = vrot.slane %v1859_v52, 5  ;;  %v5124_v53 = vld [vmem:[%s4460_s5 + $0xa0] sm:$0xf] }
  0x98   : > { %v3754_v41 = vcombine.low %v1700_v46, %v1710_v36  ;;  %v3805_v37 = vcombine.low %v2187_v10, %v2190_v1  ;;  %v1867_v6 = vrot.slane %v1865_v2, 5  ;;  %v1871_v35 = vrot.slane %v1869_v47, 4 }
  0x99   : > { %v1875_v34 = vshll.u32 %v5067_v25, 16  ;;  %v1664_v58 = vshrl.u32 %v3714_v55, 16  ;;  %v1667_v13 = vshll.u32 %v3714_v55, 16  ;;  %v1862_v60 = vor.u32 %v1861_v12, %v1858_v4  ;;  %v3711_v55 = vld [vmem:[%s4460_s5 + $0x3c] sm:$0xf] }
  0x9a   : > { %v5097_v63 = vsel %vm289_vm0, %v3754_v41, 0  ;;  %v5100_v0 = vsel %vm289_vm0, %v3805_v37, 0  ;;  %v1673_v19 = vshll.u32 %v5089_v32, 16  ;;  %v1872_v61 = vor.u32 %v1871_v35, %v1867_v6  ;;  %v5146_v35 = vld [vmem:[%s4460_s5 + $0x40] sm:$0xf] }
  0x9b   : > { %v1877_v27 = vrot.slane %v1875_v34, 5  ;;  %v1666_v11 = vrot.slane %v1664_v58, 4  ;;  %v1669_v16 = vrot.slane %v1667_v13, 5  ;;  %v1863_v5 = vrot.slane %v1862_v60, 4  ;;  %v5151_v60 = vld [vmem:[%s4460_s5 + $0x44] sm:$0x1] }
  0x9c   : > { %v1675_v22 = vrot.slane %v1673_v19, 5  ;;  %v1677_v42 = vshrl.u32 %v5089_v32, 16  ;;  %v1683_v56 = vshll.u32 %v5093_v18, 16  ;;  %4052 = vmatpush3.bf16.xpose.msra.mxu1 %v4918_v57  ;;  %v1873_v15 = vrot.slane %v1872_v61, 4 }
  0x9d   : > { %v1670_v8 = vor.u32 %v1669_v16, %v1666_v11  ;;  %v3795_v62 = vrot.slane %v3779_v20, 9  ;;  %v2235_v30 = vrot.slane %v5001_v26, 5  ;;  %4179 = vmatprep.subr.msk.bf16.mxu1 %vm289_vm0, %v4291_v14  ;;  %v1868_v51 = vsel %vm4495_vm3, %v1863_v5, %v1867_v6  ;;  %v5162_v11 = vld [vmem:[%s5960_s1 + $0x10] sm:$0xf] }
  0x9e   : > { %4038 = vmatpush3.bf16.xpose.msra.mxu0 %v4983_v23  ;;  %v1679_v21 = vrot.slane %v1677_v42, 4  ;;  %v1685_v46 = vrot.slane %v1683_v56, 5  ;;  %v2238_v57 = vrot.slane %v5006_v28, 5  ;;  %v1878_v26 = vsel %vm4495_vm3, %v1873_v15, %v1877_v27  ;;  %v3778_v27 = vld [vmem:[%s4460_s5 + $0xa8] sm:$0xe] }
  0x9f   : > { %4181 = vmatprep.subr.msk.bf16.mxu0 %vm289_vm0, %v5012_v54  ;;  %v1671_v7 = vrot.slane %v1670_v8, 4  ;;  %v5121_v23 = vsel %vm4704_vm6, %v3795_v62, %v2235_v30  ;;  %v2237_v10 = vrot.slane %v2235_v30, 4  ;;  %v5127_v52 = vcombine.low %v1868_v51, %v1878_v26  ;;  %v5131_v54 = vld [vmem:[%s4460_s5 + $0xa4] sm:$0x1] }
  0xa0   : > { %v1680_v28 = vor.u32 %v1679_v21, %v1675_v22  ;;  %v3787_v2 = vrot.slane %v3771_v38, 9  ;;  %v2179_v47 = vrot.slane %v5018_v44, 5  ;;  %v2182_v4 = vrot.slane %v5023_v59, 5 }
  0xa1   : > { %v1676_v36 = vsel %vm4495_vm3, %v1671_v7, %v1675_v22  ;;  %v5138_v1 = vsel %vm4704_vm6, %v2237_v10, %v2238_v57  ;;  %v1832_v41 = vshrl.u32 %v3735_v9, 16  ;;  %v1835_v58 = vshll.u32 %v3735_v9, 16  ;;  %v3770_v7 = vld [vmem:[%s4460_s5 + $0x48] sm:$0xe] }
  0xa2   : > { %v1681_v37 = vrot.slane %v1680_v28, 4  ;;  %v3812_v12 = vcombine.low %v5121_v23, %v5138_v1  ;;  %v2180_v44 = vsel %vm4704_vm6, %v3787_v2, %v2179_v47  ;;  %v2181_v6 = vrot.slane %v2179_v47, 4  ;;  %v3729_v23 = vld [vmem:[%s4460_s5 + $0x84] sm:$0xf] }
  0xa3   : > { %v1834_v34 = vrot.slane %v1832_v41, 4  ;;  %v1841_v13 = vshll.u32 %v5124_v53, 16  ;;  %v1845_v14 = vshrl.u32 %v5124_v53, 16  ;;  %v1851_v20 = vshll.u32 %v5131_v54, 16  ;;  %v3732_v41 = vld [vmem:[%s4460_s5 + $0x90] sm:$0xf] }
  0xa4   : > { %v1686_v59 = vsel %vm4495_vm3, %v1681_v37, %v1685_v46  ;;  %v2183_v19 = vsel %vm4704_vm6, %v2181_v6, %v2182_v4  ;;  %v1640_v61 = vshrl.u32 %v3711_v55, 16  ;;  %4054 = vmatpush3.bf16.xpose.msra.mxu1 %v4950_v17  ;;  %v1837_v22 = vrot.slane %v1835_v58, 5  ;;  %v5193_v37 = vld [vmem:[%s4460_s5 + $0x94] sm:$0xf]  ;;  %v5198_v58 = vld [vmem:[%s4460_s5 + $0x98] sm:$0x1] }
  0xa5   : > { %4040 = vmatmul.mubr.msk.bf16.vlgmr.msra.gmra.mxu0 %vm289_vm0, %v4819_v48  ;;  %v3753_v16 = vcombine.low %v1676_v36, %v1686_v59  ;;  %v3804_v5 = vcombine.low %v2180_v44, %v2183_v19  ;;  %v1843_v42 = vrot.slane %v1841_v13, 5  ;;  %4180 = vmatprep.subr.msk.bf16.mxu1 %vm289_vm0, %v4293_v39  ;;  %v1847_v56 = vrot.slane %v1845_v14, 4 }
  0xa6   : > { %4060 = vmatpush3.bf16.xpose.msra.mxu0 %v5040_v50  ;;  %v1853_v15 = vrot.slane %v1851_v20, 5  ;;  %v1642_v8 = vrot.slane %v1640_v61, 4  ;;  %v1643_v62 = vshll.u32 %v3711_v55, 16  ;;  %v1838_v30 = vor.u32 %v1837_v22, %v1834_v34  ;;  %4075 = vmatprep.mubr.msk.bf16.mxu0 %vm289_vm0, %v5162_v11  ;;  %v5227_v22 = vld [vmem:[%s4460_s5 + $0x34] sm:$0xf] }
  0xa7   : > { %4182 = vmatprep.subr.msk.bf16.mxu0 %vm289_vm0, %v5055_v43  ;;  %v5172_v17 = vsel %vm289_vm0, %v3753_v16, 0  ;;  %v5175_v48 = vsel %vm289_vm0, %v3804_v5, 0  ;;  %v1649_v38 = vshll.u32 %v5146_v35, 16  ;;  %v1848_v50 = vor.u32 %v1847_v56, %v1843_v42 }
  0xa8   : > { %v1645_v51 = vrot.slane %v1643_v62, 5  ;;  %v1653_v21 = vshrl.u32 %v5146_v35, 16  ;;  %v1659_v43 = vshll.u32 %v5151_v60, 16  ;;  %v1839_v46 = vrot.slane %v1838_v30, 4  ;;  %v3777_v62 = vld [vmem:[%s4460_s5 + $0x9c] sm:$0xe] }
  0xa9   : > { %v1651_v57 = vrot.slane %v1649_v38, 5  ;;  %v3794_v9 = vrot.slane %v3778_v27, 9  ;;  %v2228_v26 = vrot.slane %v5053_v31, 5  ;;  %v1849_v10 = vrot.slane %v1848_v50, 4 }
  0xaa   : > { %v1646_v39 = vor.u32 %v1645_v51, %v1642_v8  ;;  %v1655_v28 = vrot.slane %v1653_v21, 4  ;;  %v1661_v2 = vrot.slane %v1659_v43, 5  ;;  %v1844_v47 = vsel %vm4495_vm3, %v1839_v46, %v1843_v42  ;;  %v5232_v8 = vld [vmem:[%s4460_s5 + $0x38] sm:$0x1]  ;;  %v5238_v21 = vld [vmem:[%s5960_s1 + $0x14] sm:$0xf] }
  0xab   : > { %v5188_v55 = vsel %vm4704_vm6, %v3794_v9, %v2228_v26  ;;  %v2230_v36 = vrot.slane %v2228_v26, 4  ;;  %v2231_v4 = vrot.slane %v5067_v25, 5  ;;  %v1854_v31 = vsel %vm4495_vm3, %v1849_v10, %v1853_v15 }
  0xac   : > { %v1647_v44 = vrot.slane %v1646_v39, 4  ;;  %v1656_v6 = vor.u32 %v1655_v28, %v1651_v57  ;;  %v3786_v34 = vrot.slane %v3770_v7, 9  ;;  %4056 = vmatpush3.bf16.xpose.msra.mxu1 %v4998_v24  ;;  %v3760_v13 = vcombine.low %v1844_v47, %v1854_v31  ;;  %v3769_v28 = vld [vmem:[%s4460_s5 + $0x3c] sm:$0xe] }
  0xad   : > { %v5203_v14 = vsel %vm4704_vm6, %v2230_v36, %v2231_v4  ;;  %v2172_v25 = vrot.slane %v5089_v32, 5  ;;  %v2175_v59 = vrot.slane %v5093_v18, 5  ;;  %4189 = vmatprep.subr.msk.bf16.mxu1 %vm289_vm0, %v3813_v3  ;;  %v1808_v61 = vshrl.u32 %v3732_v41, 16  ;;  %v3708_v18 = vld [vmem:[%s4460_s5 + $0x30] sm:$0xf] }
  0xae   : > { %4062 = vmatpush3.bf16.xpose.msra.mxu0 %v5097_v63  ;;  %v1652_v24 = vsel %vm4495_vm3, %v1647_v44, %v1651_v57  ;;  %v1657_v19 = vrot.slane %v1656_v6, 4  ;;  %v3811_v20 = vcombine.low %v5188_v55, %v5203_v14  ;;  %v1811_v45 = vshll.u32 %v3732_v41, 16 }
  0xaf   : > { %4183 = vmatprep.subr.msk.bf16.mxu0 %vm289_vm0, %v5127_v52  ;;  %v2173_v32 = vsel %vm4704_vm6, %v3786_v34, %v2172_v25  ;;  %v2174_v49 = vrot.slane %v2172_v25, 4  ;;  %v1817_v3 = vshll.u32 %v5193_v37, 16  ;;  %v1810_v27 = vrot.slane %v1808_v61, 4 }
  0xb0   : > { %v1662_v63 = vsel %vm4495_vm3, %v1657_v19, %v1661_v2  ;;  %v1821_v16 = vshrl.u32 %v5193_v37, 16  ;;  %v1827_v5 = vshll.u32 %v5198_v58, 16  ;;  %v1813_v56 = vrot.slane %v1811_v45, 5 }
  0xb1   : > { %v3752_v52 = vcombine.low %v1652_v24, %v1662_v63  ;;  %v2176_v42 = vsel %vm4704_vm6, %v2174_v49, %v2175_v59  ;;  %v1819_v15 = vrot.slane %v1817_v3, 5  ;;  %v1616_v51 = vshrl.u32 %v3708_v18, 16  ;;  %v5271_v59 = vld [vmem:[%s4460_s5 + $0x88] sm:$0xf] }
  0xb2   : > { %v3803_v30 = vcombine.low %v2173_v32, %v2176_v42  ;;  %v1823_v38 = vrot.slane %v1821_v16, 4  ;;  %v1829_v50 = vrot.slane %v1827_v5, 5  ;;  %v1814_v46 = vor.u32 %v1813_v56, %v1810_v27  ;;  %v5275_v32 = vld [vmem:[%s4460_s5 + $0x8c] sm:$0x1] }
  0xb3   : > { %v1993_v43 = vsel %vm289_vm0, %v3752_v52, 0  ;;  %v1619_v57 = vshll.u32 %v3708_v18, 16  ;;  %v1625_v9 = vshll.u32 %v5227_v22, 16  ;;  %4058 = vmatmul.mubr.msk.bf16.vlgmr.msra.gmra.mxu1 %vm289_vm0, %v4873_v29  ;;  %v1618_v10 = vrot.slane %v1616_v51, 4  ;;  %v3705_v18 = vld [vmem:[%s4460_s5 + $0x24] sm:$0xf] }
  0xb4   : > { %v5245_v26 = vsel %vm289_vm0, %v3803_v30, 0  ;;  %v1824_v7 = vor.u32 %v1823_v38, %v1819_v15  ;;  %v1629_v39 = vshrl.u32 %v5227_v22, 16  ;;  %4078 = vmatpush3.bf16.xpose.msra.mxu1 %v5100_v0  ;;  %v1815_v2 = vrot.slane %v1814_v46, 4  ;;  %4093 = vmatprep.mubr.msk.bf16.mxu1 %vm289_vm0, %v5238_v21  ;;  %v5295_v38 = vld [vmem:[%s4460_s5 + $0x28] sm:$0xf] }
  0xb5   : > { %v1621_v47 = vrot.slane %v1619_v57, 5  ;;  %v1627_v36 = vrot.slane %v1625_v9, 5  ;;  %v1635_v4 = vshll.u32 %v5232_v8, 16  ;;  %4190 = vmatprep.subr.msk.bf16.mxu1 %vm289_vm0, %v3812_v12  ;;  %v3793_v0 = vrot.slane %v3777_v62, 9  ;;  %v5302_v46 = vld [vmem:[%s4460_s5 + $0x2c] sm:$0x1] }
  0xb6   : > { %4064 = vmatpush3.bf16.xpose.msra.mxu0 %v5172_v17  ;;  %v1825_v29 = vrot.slane %v1824_v7, 4  ;;  %v1631_v41 = vrot.slane %v1629_v39, 4  ;;  %v2221_v31 = vrot.slane %v5124_v53, 5  ;;  %v1820_v44 = vsel %vm4495_vm3, %v1815_v2, %v1819_v15  ;;  %v3776_v39 = vld [vmem:[%s4460_s5 + $0x90] sm:$0xe] }
  0xb7   : > { %4184 = vmatprep.subr.msk.bf16.mxu0 %vm289_vm0, %v3760_v13  ;;  %v1622_v6 = vor.u32 %v1621_v47, %v1618_v10  ;;  %v1637_v34 = vrot.slane %v1635_v4, 5  ;;  %v2224_v17 = vrot.slane %v5131_v54, 5  ;;  %v3785_v19 = vrot.slane %v3769_v28, 9 }
  0xb8   : > { %v1830_v1 = vsel %vm4495_vm3, %v1825_v29, %v1829_v50  ;;  %v1632_v12 = vor.u32 %v1631_v41, %v1627_v36  ;;  %v5268_v25 = vsel %vm4704_vm6, %v3793_v0, %v2221_v31  ;;  %v2223_v53 = vrot.slane %v2221_v31, 4  ;;  %v3768_v29 = vld [vmem:[%s4460_s5 + $0x30] sm:$0xe] }
  0xb9   : > { %v3759_v13 = vcombine.low %v1820_v44, %v1830_v1  ;;  %v1623_v24 = vrot.slane %v1622_v6, 4  ;;  %v2165_v61 = vrot.slane %v5146_v35, 5  ;;  %v2168_v45 = vrot.slane %v5151_v60, 5  ;;  %v3726_v6 = vld [vmem:[%s4460_s5 + $0x78] sm:$0xf] }
  0xba   : > { %v1633_v54 = vrot.slane %v1632_v12, 4  ;;  %v2225_v49 = vsel %vm4704_vm6, %v2223_v53, %v2224_v17  ;;  %v1784_v3 = vshrl.u32 %v3729_v23, 16  ;;  %v1787_v42 = vshll.u32 %v3729_v23, 16 }
  0xbb   : > { %v1628_v63 = vsel %vm4495_vm3, %v1623_v24, %v1627_v36  ;;  %v3810_v27 = vcombine.low %v5268_v25, %v2225_v49  ;;  %v2166_v16 = vsel %vm4704_vm6, %v3785_v19, %v2165_v61  ;;  %v2167_v35 = vrot.slane %v2165_v61, 4 }
  0xbc   : > { %v1638_v5 = vsel %vm4495_vm3, %v1633_v54, %v1637_v34  ;;  %v1786_v52 = vrot.slane %v1784_v3, 4  ;;  %v1793_v60 = vshll.u32 %v5271_v59, 16  ;;  %4080 = vmatpush3.bf16.xpose.msra.mxu1 %v5175_v48  ;;  %v1797_v62 = vshrl.u32 %v5271_v59, 16  ;;  %v5325_v54 = vld [vmem:[%s4460_s5 + $0x7c] sm:$0xf] }
  0xbd   : > { %v3751_v56 = vcombine.low %v1628_v63, %v1638_v5  ;;  %v2169_v15 = vsel %vm4704_vm6, %v2167_v35, %v2168_v45  ;;  %v1803_v30 = vshll.u32 %v5275_v32, 16  ;;  %4191 = vmatprep.subr.msk.bf16.mxu1 %vm289_vm0, %v3811_v20  ;;  %v1789_v51 = vrot.slane %v1787_v42, 5  ;;  %v5333_v3 = vld [vmem:[%s4460_s5 + $0x80] sm:$0x1]  ;;  %v3702_v5 = vld [vmem:[%s4460_s5 + $0x18] sm:$0xf] }
  0xbe   : > { %4066 = vmatpush3.bf16.xpose.msra.mxu0 %v1993_v43  ;;  %v3802_v50 = vcombine.low %v2166_v16, %v2169_v15  ;;  %v1795_v48 = vrot.slane %v1793_v60, 5  ;;  %v1592_v57 = vshrl.u32 %v3705_v18, 16  ;;  %v1799_v7 = vrot.slane %v1797_v62, 4 }
  0xbf   : > { %4185 = vmatprep.subr.msk.bf16.mxu0 %vm289_vm0, %v3759_v13  ;;  %v1990_v9 = vsel %vm289_vm0, %v3751_v56, 0  ;;  %v1805_v10 = vrot.slane %v1803_v30, 5  ;;  %v1595_v43 = vshll.u32 %v3705_v18, 16  ;;  %v1790_v14 = vor.u32 %v1789_v51, %v1786_v52  ;;  %v5350_v30 = vld [vmem:[%s4460_s5 + $0x20] sm:$0x1] }
  0xc0   : > { %v5308_v55 = vsel %vm289_vm0, %v3802_v50, 0  ;;  %v1594_v20 = vrot.slane %v1592_v57, 4  ;;  %v1601_v28 = vshll.u32 %v5295_v38, 16  ;;  %v1800_v2 = vor.u32 %v1799_v7, %v1795_v48 }
  0xc1   : > { %v1597_v47 = vrot.slane %v1595_v43, 5  ;;  %v1605_v36 = vshrl.u32 %v5295_v38, 16  ;;  %v1611_v4 = vshll.u32 %v5302_v46, 16  ;;  %v1791_v41 = vrot.slane %v1790_v14, 4 }
  0xc2   : > { %v1603_v0 = vrot.slane %v1601_v28, 5  ;;  %v3792_v31 = vrot.slane %v3776_v39, 9  ;;  %v2214_v44 = vrot.slane %v5193_v37, 5  ;;  %v1801_v34 = vrot.slane %v1800_v2, 4  ;;  %v3775_v2 = vld [vmem:[%s4460_s5 + $0x84] sm:$0xe] }
  0xc3   : > { %v1598_v17 = vor.u32 %v1597_v47, %v1594_v20  ;;  %v1607_v23 = vrot.slane %v1605_v36, 4  ;;  %v1613_v1 = vrot.slane %v1611_v4, 5  ;;  %v1796_v12 = vsel %vm4495_vm3, %v1791_v41, %v1795_v48 }
  0xc4   : > { %v2215_v25 = vsel %vm4704_vm6, %v3792_v31, %v2214_v44  ;;  %v2216_v53 = vrot.slane %v2214_v44, 4  ;;  %v2217_v13 = vrot.slane %v5198_v58, 5  ;;  %4082 = vmatpush3.bf16.xpose.msra.mxu1 %v5245_v26  ;;  %v1806_v37 = vsel %vm4495_vm3, %v1801_v34, %v1805_v10 }
  0xc5   : > { %v1599_v24 = vrot.slane %v1598_v17, 4  ;;  %v1608_v19 = vor.u32 %v1607_v23, %v1603_v0  ;;  %v3784_v61 = vrot.slane %v3768_v29, 9  ;;  %4192 = vmatprep.subr.msk.bf16.mxu1 %vm289_vm0, %v3810_v27  ;;  %v3758_v49 = vcombine.low %v1796_v12, %v1806_v37  ;;  %v3767_v23 = vld [vmem:[%s4460_s5 + $0x24] sm:$0xe]  ;;  %v5369_v37 = vld [vmem:[%s4460_s5 + $0x70] sm:$0xf] }
  0xc6   : > { %4068 = vmatpush3.bf16.xpose.msra.mxu0 %v1990_v9  ;;  %v2218_v45 = vsel %vm4704_vm6, %v2216_v53, %v2217_v13  ;;  %v2158_v58 = vrot.slane %v5227_v22, 5  ;;  %v2161_v26 = vrot.slane %v5232_v8, 5  ;;  %v1760_v35 = vshrl.u32 %v3726_v6, 16  ;;  %v5343_v8 = vld [vmem:[%s4460_s5 + $0x1c] sm:$0xf] }
  0xc7   : > { %v1604_v18 = vsel %vm4495_vm3, %v1599_v24, %v1603_v0  ;;  %v1609_v63 = vrot.slane %v1608_v19, 4  ;;  %v3809_v16 = vcombine.low %v2215_v25, %v2218_v45  ;;  %4186 = vmatprep.subr.msk.bf16.mxu0 %vm289_vm0, %v3758_v49  ;;  %v1763_v42 = vshll.u32 %v3726_v6, 16  ;;  %v3723_v13 = vld [vmem:[%s4460_s5 + $0x6c] sm:$0xf]  ;;  %v5376_v49 = vld [vmem:[%s4460_s5 + $0x74] sm:$0x1] }
  0xc8   : > { %v2159_v27 = vsel %vm4704_vm6, %v3784_v61, %v2158_v58  ;;  %v2160_v52 = vrot.slane %v2158_v58, 4  ;;  %v1769_v22 = vshll.u32 %v5325_v54, 16  ;;  %v1762_v56 = vrot.slane %v1760_v35, 4 }
  0xc9   : > { %v1614_v60 = vsel %vm4495_vm3, %v1609_v63, %v1613_v1  ;;  %v1773_v15 = vshrl.u32 %v5325_v54, 16  ;;  %v1779_v62 = vshll.u32 %v5333_v3, 16  ;;  %v1765_v48 = vrot.slane %v1763_v42, 5 }
  0xca   : > { %v3750_v50 = vcombine.low %v1604_v18, %v1614_v60  ;;  %v2162_v51 = vsel %vm4704_vm6, %v2160_v52, %v2161_v26  ;;  %v1771_v57 = vrot.slane %v1769_v22, 5  ;;  %v1568_v43 = vshrl.u32 %v3702_v5, 16 }
  0xcb   : > { %v3801_v9 = vcombine.low %v2159_v27, %v2162_v51  ;;  %v1775_v7 = vrot.slane %v1773_v15, 4  ;;  %v1781_v10 = vrot.slane %v1779_v62, 5  ;;  %v1766_v14 = vor.u32 %v1765_v48, %v1762_v56  ;;  %v5397_v48 = vld [vmem:[%s4460_s5 + $0x10] sm:$0xf] }
  0xcc   : > { %v1987_v39 = vsel %vm289_vm0, %v3750_v50, 0  ;;  %v1571_v20 = vshll.u32 %v3702_v5, 16  ;;  %v1577_v28 = vshll.u32 %v5343_v8, 16  ;;  %4084 = vmatpush3.bf16.xpose.msra.mxu1 %v5308_v55  ;;  %v1570_v4 = vrot.slane %v1568_v43, 4 }
  0xcd   : > { %v2310_v47 = vsel %vm289_vm0, %v3801_v9, 0  ;;  %v1776_v36 = vor.u32 %v1775_v7, %v1771_v57  ;;  %v1581_v29 = vshrl.u32 %v5343_v8, 16  ;;  %4193 = vmatprep.subr.msk.bf16.mxu1 %vm289_vm0, %v3809_v16  ;;  %v1767_v41 = vrot.slane %v1766_v14, 4 }
  0xce   : > { %4070 = vmatpush3.bf16.xpose.msra.mxu0 %v1987_v39  ;;  %v1573_v0 = vrot.slane %v1571_v20, 5  ;;  %v1579_v31 = vrot.slane %v1577_v28, 5  ;;  %v1587_v44 = vshll.u32 %v5350_v30, 16  ;;  %v3791_v55 = vrot.slane %v3775_v2, 9  ;;  %v3774_v2 = vld [vmem:[%s4460_s5 + $0x78] sm:$0xe] }
  0xcf   : > { %v1777_v6 = vrot.slane %v1776_v36, 4  ;;  %v1583_v34 = vrot.slane %v1581_v29, 4  ;;  %v2207_v17 = vrot.slane %v5271_v59, 5  ;;  %v1772_v1 = vsel %vm4495_vm3, %v1767_v41, %v1771_v57 }
  0xd0   : > { %v1574_v12 = vor.u32 %v1573_v0, %v1570_v4  ;;  %v1589_v25 = vrot.slane %v1587_v44, 5  ;;  %v2210_v53 = vrot.slane %v5275_v32, 5  ;;  %v3783_v26 = vrot.slane %v3767_v23, 9  ;;  %v3766_v23 = vld [vmem:[%s4460_s5 + $0x18] sm:$0xe] }
  0xd1   : > { %v1782_v24 = vsel %vm4495_vm3, %v1777_v6, %v1781_v10  ;;  %v1584_v19 = vor.u32 %v1583_v34, %v1579_v31  ;;  %v2208_v61 = vsel %vm4704_vm6, %v3791_v55, %v2207_v17  ;;  %v2209_v59 = vrot.slane %v2207_v17, 4  ;;  %v5400_v10 = vld [vmem:[%s4460_s5 + $0x14] sm:$0x1] }
  0xd2   : > { %v3757_v45 = vcombine.low %v1772_v1, %v1782_v24  ;;  %v1575_v58 = vrot.slane %v1574_v12, 4  ;;  %v2151_v18 = vrot.slane %v5295_v38, 5  ;;  %v2154_v16 = vrot.slane %v5302_v46, 5  ;;  %v3699_v38 = vld [vmem:[%s4460_s5 + $0xc] sm:$0xf] }
  0xd3   : > { %v1585_v32 = vrot.slane %v1584_v19, 4  ;;  %v2211_v63 = vsel %vm4704_vm6, %v2209_v59, %v2210_v53  ;;  %v1736_v35 = vshrl.u32 %v3723_v13, 16  ;;  %v1739_v46 = vshll.u32 %v3723_v13, 16  ;;  %v3773_v59 = vld [vmem:[%s4460_s5 + $0x6c] sm:$0xe] }
  0xd4   : > { %4187 = vmatprep.subr.msk.bf16.mxu0 %vm289_vm0, %v3757_v45  ;;  %v1580_v5 = vsel %vm4495_vm3, %v1575_v58, %v1579_v31  ;;  %v3808_v27 = vcombine.low %v2208_v61, %v2211_v63  ;;  %v2152_v52 = vsel %vm4704_vm6, %v3783_v26, %v2151_v18  ;;  %v2153_v42 = vrot.slane %v2151_v18, 4  ;;  %4086 = vmatpush3.bf16.xpose.msra.mxu1 %v2310_v47  ;;  %v4296_v18 = vld [vmem:[%s4460_s5 + $0x6c] sm:$0xff]  }
  0xd5   : > { %v1590_v22 = vsel %vm4495_vm3, %v1585_v32, %v1589_v25  ;;  %v1738_v60 = vrot.slane %v1736_v35, 4  ;;  %v1745_v56 = vshll.u32 %v5369_v37, 16  ;;  %v1749_v50 = vshrl.u32 %v5369_v37, 16 }
  0xd6   : > { %v3749_v15 = vcombine.low %v1580_v5, %v1590_v22  ;;  %4194 = vmatprep.subr.msk.bf16.mxu1 %vm289_vm0, %v3808_v27  ;;  %v2155_v62 = vsel %vm4704_vm6, %v2153_v42, %v2154_v16  ;;  %v1755_v51 = vshll.u32 %v5376_v49, 16  ;;  %v1741_v9 = vrot.slane %v1739_v46, 5  ;;  %v3765_v5 = vld [vmem:[%s4460_s5 + $0xc] sm:$0xe] }
  0xd7   : > { %v3800_v57 = vcombine.low %v2152_v52, %v2155_v62  ;;  %v1747_v7 = vrot.slane %v1745_v56, 5  ;;  %v1544_v43 = vshrl.u32 %v3699_v38, 16  ;;  %v1751_v14 = vrot.slane %v1749_v50, 4  ;;  %v3910_v50 = vld [vmem:[%s4460_s5 + $0xcc] sm:$0xf] }
  0xd8   : > { %v1984_v39 = vsel %vm289_vm0, %v3749_v15, 0  ;;  %v1757_v20 = vrot.slane %v1755_v51, 5  ;;  %v1547_v28 = vshll.u32 %v3699_v38, 16  ;;  %v1742_v36 = vor.u32 %v1741_v9, %v1738_v60 }
  0xd9   : > { %4072 = vmatpush3.bf16.xpose.msra.mxu0 %v1984_v39  ;;  %v2307_v47 = vsel %vm289_vm0, %v3800_v57, 0  ;;  %v1546_v4 = vrot.slane %v1544_v43, 4  ;;  %v1553_v29 = vshll.u32 %v5397_v48, 16  ;;  %v1752_v41 = vor.u32 %v1751_v14, %v1747_v7 }
  0xda   : > { %v1549_v0 = vrot.slane %v1547_v28, 5  ;;  %v1557_v31 = vshrl.u32 %v5397_v48, 16  ;;  %v1563_v44 = vshll.u32 %v5400_v10, 16  ;;  %v1743_v6 = vrot.slane %v1742_v36, 4 }
  0xdb   : > { %v1555_v34 = vrot.slane %v1553_v29, 5  ;;  %v3790_v55 = vrot.slane %v3774_v2, 9  ;;  %v2200_v17 = vrot.slane %v5325_v54, 5  ;;  %v1753_v1 = vrot.slane %v1752_v41, 4 }
  0xdc   : > { %v1550_v12 = vor.u32 %v1549_v0, %v1546_v4  ;;  %v1559_v25 = vrot.slane %v1557_v31, 4  ;;  %v1565_v53 = vrot.slane %v1563_v44, 5  ;;  %4088 = vmatpush3.bf16.xpose.msra.mxu1 %v2307_v47  ;;  %v1748_v13 = vsel %vm4495_vm3, %v1743_v6, %v1747_v7  ;;  %v3886_v4 = vld [vmem:[%s4460_s5 + $0x6c] sm:$0xf]  ;;  %v5465_v31 = vld [vmem:[%s4460_s5 + $0x70] sm:$0xf] }
  0xdd   : > { %v2201_v24 = vsel %vm4704_vm6, %v3790_v55, %v2200_v17  ;;  %v2202_v19 = vrot.slane %v2200_v17, 4  ;;  %v2203_v61 = vrot.slane %v5333_v3, 5  ;;  %v1758_v54 = vsel %vm4495_vm3, %v1753_v1, %v1757_v20  ;;  %v5452_v20 = vld [vmem:[%s4460_s5 + $0xd4] sm:$0x1] }
  0xde   : > { %v1551_v45 = vrot.slane %v1550_v12, 4  ;;  %v1560_v58 = vor.u32 %v1559_v25, %v1555_v34  ;;  %v3782_v26 = vrot.slane %v3766_v23, 9  ;;  %v3756_v32 = vcombine.low %v1748_v13, %v1758_v54  ;;  %v4300_v17 = vld [vmem:[%s4460_s5 + $0x54] sm:$0xff]  }
  0xdf   : > { %v2204_v63 = vsel %vm4704_vm6, %v2202_v19, %v2203_v61  ;;  %v2144_v16 = vrot.slane %v5343_v8, 5  ;;  %v2147_v35 = vrot.slane %v5350_v30, 5  ;;  %v3789_v42 = vrot.slane %v3773_v59, 9  ;;  %v4298_v30 = vld [vmem:[%s4460_s5 + $0x60] sm:$0xff]   ;;  %v5474_v12 = vld [vmem:[%s4460_s5 + $0x74] sm:$0x1] }
  0xe0   : > { %v1556_v3 = vsel %vm4495_vm3, %v1551_v45, %v1555_v34  ;;  %v1561_v27 = vrot.slane %v1560_v58, 4  ;;  %v3807_v52 = vcombine.low %v2201_v24, %v2204_v63  ;;  %4188 = vmatprep.subr.msk.bf16.mxu0 %vm289_vm0, %v3756_v32  ;;  %v2193_v60 = vrot.slane %v5369_v37, 5  ;;  %v3907_v59 = vld [vmem:[%s4460_s5 + $0xc0] sm:$0xf] }
  0xe1   : > { %v2145_v38 = vsel %vm4704_vm6, %v3782_v26, %v2144_v16  ;;  %v2146_v22 = vrot.slane %v2144_v16, 4  ;;  %v2196_v8 = vrot.slane %v5376_v49, 5  ;;  %v5436_v56 = vsel %vm289_vm0, %v4296_v18, 0  ;;  %v4295_v49 = vld [vmem:[%s4460_s5 + $0xcc] sm:$0xff]   ;;  %v5480_v18 = vld [vmem:[%s4460_s5 + $0xc4] sm:$0xf] }
  0xe2   : > { %v1566_v46 = vsel %vm4495_vm3, %v1561_v27, %v1565_v53  ;;  %4195 = vmatprep.subr.msk.bf16.mxu1 %vm289_vm0, %v3807_v52  ;;  %v3781_v15 = vrot.slane %v3765_v5, 9  ;;  %v2137_v62 = vrot.slane %v5397_v48, 5  ;;  %v2194_v57 = vsel %vm4704_vm6, %v3789_v42, %v2193_v60  ;;  %v5449_v48 = vld [vmem:[%s4460_s5 + $0xd0] sm:$0xf]  ;;  %v4297_v32 = vld [vmem:[%s4460_s5 + $0xc0] sm:$0xff]  }
  0xe3   : > { %v3748_v51 = vcombine.low %v1556_v3, %v1566_v46  ;;  %v2148_v37 = vsel %vm4704_vm6, %v2146_v22, %v2147_v35  ;;  %v2195_v9 = vrot.slane %v2193_v60, 4  ;;  %v2140_v14 = vrot.slane %v5400_v10, 5  ;;  %v5488_v3 = vld [vmem:[%s5960_s1 + $0x18] sm:$0xf] }
  0xe4   : > { %v3799_v7 = vcombine.low %v2145_v38, %v2148_v37  ;;  %v2138_v43 = vsel %vm4704_vm6, %v3781_v15, %v2137_v62  ;;  %v2139_v39 = vrot.slane %v2137_v62, 4  ;;  %v5458_v47 = vsel %vm289_vm0, %v4298_v30, 0  ;;  %v5496_v30 = vld [vmem:[%s4460_s5 + $0xc8] sm:$0x1]  ;;  %v3883_v37 = vld [vmem:[%s4460_s5 + $0x60] sm:$0xf] }
  0xe5   : > { %v1981_v28 = vsel %vm289_vm0, %v3748_v51, 0  ;;  %v2197_v2 = vsel %vm4704_vm6, %v2195_v9, %v2196_v8  ;;  %v3009_v36 = vshrl.u32 %v3910_v50, 16  ;;  %v3012_v0 = vshll.u32 %v3910_v50, 16  ;;  %v5510_v9 = vld [vmem:[%s4460_s5 + $0x64] sm:$0xf] }
  0xe6   : > { %4074 = vmatpush3.bf16.xpose.msra.mxu0 %v1981_v28  ;;  %v2304_v29 = vsel %vm289_vm0, %v3799_v7, 0  ;;  %v3806_v10 = vcombine.low %v2194_v57, %v2197_v2  ;;  %v2141_v41 = vsel %vm4704_vm6, %v2139_v39, %v2140_v14  ;;  %v3018_v34 = vshll.u32 %v5449_v48, 16 }
  0xe7   : > { %4090 = vmatpush3.bf16.xpose.msra.mxu1 %v2304_v29  ;;  %4197 = vmatprep.subr.msk.bf16.mxu0 %vm289_vm0, %v4295_v49  ;;  %v3798_v44 = vcombine.low %v2138_v43, %v2141_v41  ;;  %v3011_v6 = vrot.slane %v3009_v36, 4  ;;  %v3022_v55 = vshrl.u32 %v5449_v48, 16  ;;  %v3014_v23 = vrot.slane %v3012_v0, 5  ;;  %v4302_v29 = vld [vmem:[%s4460_s5 + $0x48] sm:$0xff]  }
  0xe8   : > { %4196 = vmatprep.subr.msk.bf16.mxu1 %vm289_vm0, %v3806_v10  ;;  %v3028_v1 = vshll.u32 %v5452_v20, 16  ;;  %v2817_v25 = vshrl.u32 %v3886_v4, 16  ;;  %v2820_v53 = vshll.u32 %v3886_v4, 16  ;;  %v3020_v24 = vrot.slane %v3018_v34, 5  ;;  %v5518_v41 = vld [vmem:[%s4460_s5 + $0x68] sm:$0x1] }
  0xe9   : > { %v2301_v13 = vsel %vm289_vm0, %v3798_v44, 0  ;;  %v3024_v19 = vrot.slane %v3022_v55, 4  ;;  %v2826_v61 = vshll.u32 %v5465_v31, 16  ;;  %v3015_v54 = vor.u32 %v3014_v23, %v3011_v6  ;;  %v4299_v55 = vld [vmem:[%s4460_s5 + $0xb4] sm:$0xff]  }
  0xea   : > { %v3030_v45 = vrot.slane %v3028_v1, 5  ;;  %v2819_v58 = vrot.slane %v2817_v25, 4  ;;  %v2822_v26 = vrot.slane %v2820_v53, 5  ;;  %v2830_v35 = vshrl.u32 %v5465_v31, 16  ;;  %v3904_v25 = vld [vmem:[%s4460_s5 + $0xb4] sm:$0xf] }
  0xeb   : > { %v3025_v63 = vor.u32 %v3024_v19, %v3020_v24  ;;  %v2828_v16 = vrot.slane %v2826_v61, 5  ;;  %v2836_v5 = vshll.u32 %v5474_v12, 16  ;;  %v3016_v27 = vrot.slane %v3015_v54, 4  ;;  %v5527_v61 = vld [vmem:[%s4460_s5 + $0xb8] sm:$0xf] }
  0xec   : > { %v2823_v52 = vor.u32 %v2822_v26, %v2819_v58  ;;  %v5491_v42 = vsel %vm289_vm0, %v4300_v17, 0  ;;  %v2985_v38 = vshrl.u32 %v3907_v59, 16  ;;  %v2832_v60 = vrot.slane %v2830_v35, 4  ;;  %v5538_v26 = vld [vmem:[%s5960_s1 + $0x1c] sm:$0xf] }
  0xed   : > { %4076 = vmatmul.mubr.msk.bf16.vlgmr.msra.gmra.mxu0 %vm289_vm0, %v5162_v11  ;;  %v3026_v22 = vrot.slane %v3025_v63, 4  ;;  %v2838_v8 = vrot.slane %v2836_v5, 5  ;;  %v2988_v46 = vshll.u32 %v3907_v59, 16  ;;  %v3021_v15 = vsel %vm4495_vm3, %v3016_v27, %v3020_v24  ;;  %v5545_v35 = vld [vmem:[%s4460_s5 + $0xbc] sm:$0x1] }
  0xee   : > { %4096 = vmatpush3.bf16.xpose.msra.mxu0 %v5436_v56  ;;  %v2824_v62 = vrot.slane %v2823_v52, 4  ;;  %v2987_v50 = vrot.slane %v2985_v38, 4  ;;  %v2994_v51 = vshll.u32 %v5480_v18, 16  ;;  %4111 = vmatprep.mubr.msk.bf16.mxu0 %vm289_vm0, %v5488_v3  ;;  %v2833_v56 = vor.u32 %v2832_v60, %v2828_v16 }
  0xef   : > { %4092 = vmatpush3.bf16.xpose.msra.mxu1 %v2301_v13  ;;  %4198 = vmatprep.subr.msk.bf16.mxu0 %vm289_vm0, %v4297_v32  ;;  %v3031_v11 = vsel %vm4495_vm3, %v3026_v22, %v3030_v45  ;;  %v2990_v49 = vrot.slane %v2988_v46, 5  ;;  %v2998_v57 = vshrl.u32 %v5480_v18, 16  ;;  %v3004_v14 = vshll.u32 %v5496_v30, 16 }
  0xf0   : > { %v3929_v7 = vcombine.low %v3021_v15, %v3031_v11  ;;  %v2829_v43 = vsel %vm4495_vm3, %v2824_v62, %v2828_v16  ;;  %v2996_v39 = vrot.slane %v2994_v51, 5  ;;  %v2834_v28 = vrot.slane %v2833_v56, 4 }
  0xf1   : > { %v2991_v2 = vor.u32 %v2990_v49, %v2987_v50  ;;  %v3000_v36 = vrot.slane %v2998_v57, 4  ;;  %v2793_v4 = vshrl.u32 %v3883_v37, 16  ;;  %v3006_v10 = vrot.slane %v3004_v14, 5  ;;  %v5565_v49 = vld [vmem:[%s4460_s5 + $0x5c] sm:$0x1]  ;;  %v4301_v14 = vld [vmem:[%s4460_s5 + $0xa8] sm:$0xff]  }
  0xf2   : > { %4205 = vmatprep.subr.msk.bf16.mxu1 %vm289_vm0, %v3929_v7  ;;  %v2796_v0 = vshll.u32 %v3883_v37, 16  ;;  %v2802_v44 = vshll.u32 %v5510_v9, 16  ;;  %v2806_v6 = vshrl.u32 %v5510_v9, 16  ;;  %v2839_v34 = vsel %vm4495_vm3, %v2834_v28, %v2838_v8  ;;  %v5557_v37 = vld [vmem:[%s4460_s5 + $0x58] sm:$0xf] }
  0xf3   : > { %v2992_v17 = vrot.slane %v2991_v2, 4  ;;  %v3001_v23 = vor.u32 %v3000_v36, %v2996_v39  ;;  %v2795_v1 = vrot.slane %v2793_v4, 4  ;;  %v3921_v53 = vcombine.low %v2829_v43, %v2839_v34  ;;  %v4304_v43 = vld [vmem:[%s4460_s5 + $0x3c] sm:$0xff]  }
  0xf4   : > { %v2798_v13 = vrot.slane %v2796_v0, 5  ;;  %v2804_v24 = vrot.slane %v2802_v44, 5  ;;  %v2808_v19 = vrot.slane %v2806_v6, 4  ;;  %v2812_v45 = vshll.u32 %v5518_v41, 16  ;;  %v3901_v44 = vld [vmem:[%s4460_s5 + $0xa8] sm:$0xf] }
  0xf5   : > { %v2997_v59 = vsel %vm4495_vm3, %v2992_v17, %v2996_v39  ;;  %v3002_v54 = vrot.slane %v3001_v23, 4  ;;  %v5533_v58 = vsel %vm289_vm0, %v4302_v29, 0  ;;  %v3107_v32 = vsel %vm289_vm0, %v3921_v53, 0  ;;  %v5575_v23 = vld [vmem:[%s4460_s5 + $0xac] sm:$0xf] }
  0xf6   : > { %4094 = vmatmul.mubr.msk.bf16.vlgmr.msra.gmra.mxu1 %vm289_vm0, %v5238_v21  ;;  %4098 = vmatpush3.bf16.xpose.msra.mxu0 %v5458_v47  ;;  %v2799_v63 = vor.u32 %v2798_v13, %v2795_v1  ;;  %v2809_v16 = vor.u32 %v2808_v19, %v2804_v24  ;;  %v2961_v5 = vshrl.u32 %v3904_v25, 16  ;;  %v2814_v52 = vrot.slane %v2812_v45, 5  ;;  %v3880_v47 = vld [vmem:[%s4460_s5 + $0x54] sm:$0xf] }
  0xf7   : > { %4114 = vmatpush3.bf16.xpose.msra.mxu1 %v3107_v32  ;;  %4199 = vmatprep.subr.msk.bf16.mxu0 %vm289_vm0, %v4299_v55  ;;  %v3007_v27 = vsel %vm4495_vm3, %v3002_v54, %v3006_v10  ;;  %v2964_v38 = vshll.u32 %v3904_v25, 16  ;;  %v2970_v21 = vshll.u32 %v5527_v61, 16  ;;  %v2974_v50 = vshrl.u32 %v5527_v61, 16 }
  0xf8   : > { %v3928_v22 = vcombine.low %v2997_v59, %v3007_v27  ;;  %v2800_v60 = vrot.slane %v2799_v63, 4  ;;  %v2810_v8 = vrot.slane %v2809_v16, 4  ;;  %v2963_v46 = vrot.slane %v2961_v5, 4  ;;  %4129 = vmatprep.mubr.msk.bf16.mxu1 %vm289_vm0, %v5538_v26  ;;  %v3877_v5 = vld [vmem:[%s4460_s5 + $0x48] sm:$0xf] }
  0xf9   : > { %v2966_v15 = vrot.slane %v2964_v38, 5  ;;  %v2972_v62 = vrot.slane %v2970_v21, 5  ;;  %v2980_v51 = vshll.u32 %v5545_v35, 16  ;;  %v2769_v57 = vshrl.u32 %v3880_v47, 16 }
  0xfa   : > { %4206 = vmatprep.subr.msk.bf16.mxu1 %vm289_vm0, %v3928_v22  ;;  %v2805_v11 = vsel %vm4495_vm3, %v2800_v60, %v2804_v24  ;;  %v2815_v56 = vsel %vm4495_vm3, %v2810_v8, %v2814_v52  ;;  %v2772_v7 = vshll.u32 %v3880_v47, 16  ;;  %v2976_v2 = vrot.slane %v2974_v50, 4  ;;  %v5582_v24 = vld [vmem:[%s4460_s5 + $0xb0] sm:$0x1]  ;;  %v5594_v47 = vld [vmem:[%s4460_s5 + $0x4c] sm:$0xf] }
  0xfb   : > { %v3920_v39 = vcombine.low %v2805_v11, %v2815_v56  ;;  %v2967_v28 = vor.u32 %v2966_v15, %v2963_v46  ;;  %v2982_v36 = vrot.slane %v2980_v51, 5  ;;  %v2771_v4 = vrot.slane %v2769_v57, 4  ;;  %v4303_v46 = vld [vmem:[%s4460_s5 + $0x9c] sm:$0xff]   ;;  %v5601_v56 = vld [vmem:[%s4460_s5 + $0x50] sm:$0x1] }
  0xfc   : > { %v2774_v29 = vrot.slane %v2772_v7, 5  ;;  %v2778_v10 = vshll.u32 %v5557_v37, 16  ;;  %v2782_v0 = vshrl.u32 %v5557_v37, 16  ;;  %v2977_v55 = vor.u32 %v2976_v2, %v2972_v62 }
  0xfd   : > { %v3104_v6 = vsel %vm289_vm0, %v3920_v39, 0  ;;  %v2968_v34 = vrot.slane %v2967_v28, 4  ;;  %v2788_v17 = vshll.u32 %v5565_v49, 16  ;;  %v5579_v13 = vsel %vm289_vm0, %v4304_v43, 0 }
  0xfe   : > { %4100 = vmatpush3.bf16.xpose.msra.mxu0 %v5491_v42  ;;  %v2775_v1 = vor.u32 %v2774_v29, %v2771_v4  ;;  %v2780_v25 = vrot.slane %v2778_v10, 5  ;;  %v2784_v53 = vrot.slane %v2782_v0, 4  ;;  %v2978_v59 = vrot.slane %v2977_v55, 4  ;;  %v3898_v29 = vld [vmem:[%s4460_s5 + $0x9c] sm:$0xf] }
  0xff   : > { %4116 = vmatpush3.bf16.xpose.msra.mxu1 %v3104_v6  ;;  %4200 = vmatprep.subr.msk.bf16.mxu0 %vm289_vm0, %v4301_v14  ;;  %v2973_v19 = vsel %vm4495_vm3, %v2968_v34, %v2972_v62  ;;  %v2790_v54 = vrot.slane %v2788_v17, 5  ;;  %v2937_v42 = vshrl.u32 %v3901_v44, 16  ;;  %v2940_v63 = vshll.u32 %v3901_v44, 16  ;;  %v4306_v62 = vld [vmem:[%s4460_s5 + $0x30] sm:$0xff]   ;;  %v5612_v34 = vld [vmem:[%s4460_s5 + $0xa0] sm:$0xf] }
 0x100   : > { %v2776_v45 = vrot.slane %v2775_v1, 4  ;;  %v2785_v32 = vor.u32 %v2784_v53, %v2780_v25  ;;  %v2946_v16 = vshll.u32 %v5575_v23, 16  ;;  %v2983_v27 = vsel %vm4495_vm3, %v2978_v59, %v2982_v36  ;;  %v5622_v59 = vld [vmem:[%s4460_s5 + $0xa4] sm:$0x1] }
 0x101   : > { %v2939_v52 = vrot.slane %v2937_v42, 4  ;;  %v2950_v38 = vshrl.u32 %v5575_v23, 16  ;;  %v2956_v21 = vshll.u32 %v5582_v24, 16  ;;  %v3927_v22 = vcombine.low %v2973_v19, %v2983_v27 }
 0x102   : > { %v2781_v60 = vsel %vm4495_vm3, %v2776_v45, %v2780_v25  ;;  %v2786_v8 = vrot.slane %v2785_v32, 4  ;;  %v2942_v15 = vrot.slane %v2940_v63, 5  ;;  %v2948_v50 = vrot.slane %v2946_v16, 5  ;;  %v3874_v16 = vld [vmem:[%s4460_s5 + $0x3c] sm:$0xf] }
 0x103   : > { %v2952_v51 = vrot.slane %v2950_v38, 4  ;;  %v2958_v11 = vrot.slane %v2956_v21, 5  ;;  %v2745_v57 = vshrl.u32 %v3877_v5, 16  ;;  %4207 = vmatprep.subr.msk.bf16.mxu1 %vm289_vm0, %v3927_v22  ;;  %v2748_v39 = vshll.u32 %v3877_v5, 16  ;;  %v5630_v21 = vld [vmem:[%s4460_s5 + $0x40] sm:$0xf] }
 0x104   : > { %v2791_v7 = vsel %vm4495_vm3, %v2786_v8, %v2790_v54  ;;  %v2943_v43 = vor.u32 %v2942_v15, %v2939_v52  ;;  %v2754_v14 = vshll.u32 %v5594_v47, 16  ;;  %v2758_v4 = vshrl.u32 %v5594_v47, 16 }
 0x105   : > { %v3919_v28 = vcombine.low %v2781_v60, %v2791_v7  ;;  %v2953_v2 = vor.u32 %v2952_v51, %v2948_v50  ;;  %v2747_v36 = vrot.slane %v2745_v57, 4  ;;  %v2750_v0 = vrot.slane %v2748_v39, 5  ;;  %v4305_v60 = vld [vmem:[%s4460_s5 + $0x90] sm:$0xff]   ;;  %v5638_v51 = vld [vmem:[%s4460_s5 + $0x44] sm:$0x1] }
 0x106   : > { %4102 = vmatpush3.bf16.xpose.msra.mxu0 %v5533_v58  ;;  %v2944_v10 = vrot.slane %v2943_v43, 4  ;;  %v2756_v44 = vrot.slane %v2754_v14, 5  ;;  %v2764_v6 = vshll.u32 %v5601_v56, 16  ;;  %v2760_v1 = vrot.slane %v2758_v4, 4  ;;  %v4308_v7 = vld [vmem:[%s4460_s5 + $0x24] sm:$0xff]  }
 0x107   : > { %v3101_v55 = vsel %vm289_vm0, %v3919_v28, 0  ;;  %4201 = vmatprep.subr.msk.bf16.mxu0 %vm289_vm0, %v4303_v46  ;;  %v2954_v17 = vrot.slane %v2953_v2, 4  ;;  %v5617_v25 = vsel %vm289_vm0, %v4306_v62, 0  ;;  %v2751_v53 = vor.u32 %v2750_v0, %v2747_v36 }
 0x108   : > { %4118 = vmatpush3.bf16.xpose.msra.mxu1 %v3101_v55  ;;  %v2949_v58 = vsel %vm4495_vm3, %v2944_v10, %v2948_v50  ;;  %v2766_v19 = vrot.slane %v2764_v6, 5  ;;  %v2913_v54 = vshrl.u32 %v3898_v29, 16  ;;  %v2761_v45 = vor.u32 %v2760_v1, %v2756_v44  ;;  %v3895_v10 = vld [vmem:[%s4460_s5 + $0x90] sm:$0xf] }
 0x109   : > { %v2959_v42 = vsel %vm4495_vm3, %v2954_v17, %v2958_v11  ;;  %v2916_v32 = vshll.u32 %v3898_v29, 16  ;;  %v2922_v63 = vshll.u32 %v5612_v34, 16  ;;  %v2752_v27 = vrot.slane %v2751_v53, 4  ;;  %v5650_v17 = vld [vmem:[%s4460_s5 + $0x94] sm:$0xf] }
 0x10a   : > { %v3926_v5 = vcombine.low %v2949_v58, %v2959_v42  ;;  %v2915_v52 = vrot.slane %v2913_v54, 4  ;;  %v2926_v38 = vshrl.u32 %v5612_v34, 16  ;;  %v2762_v22 = vrot.slane %v2761_v45, 4  ;;  %v5659_v45 = vld [vmem:[%s4460_s5 + $0x98] sm:$0x1] }
 0x10b   : > { %v2918_v8 = vrot.slane %v2916_v32, 5  ;;  %v2924_v46 = vrot.slane %v2922_v63, 5  ;;  %v2932_v15 = vshll.u32 %v5622_v59, 16  ;;  %v2757_v62 = vsel %vm4495_vm3, %v2752_v27, %v2756_v44 }
 0x10c   : > { %4208 = vmatprep.subr.msk.bf16.mxu1 %vm289_vm0, %v3926_v5  ;;  %v2928_v50 = vrot.slane %v2926_v38, 4  ;;  %v2721_v11 = vshrl.u32 %v3874_v16, 16  ;;  %v2724_v57 = vshll.u32 %v3874_v16, 16  ;;  %v2767_v43 = vsel %vm4495_vm3, %v2762_v22, %v2766_v19 }
 0x10d   : > { %v2919_v39 = vor.u32 %v2918_v8, %v2915_v52  ;;  %v2934_v14 = vrot.slane %v2932_v15, 5  ;;  %v2730_v28 = vshll.u32 %v5630_v21, 16  ;;  %v3918_v2 = vcombine.low %v2757_v62, %v2767_v43  ;;  %v3871_v52 = vld [vmem:[%s4460_s5 + $0x30] sm:$0xf]  ;;  %v5668_v15 = vld [vmem:[%s4460_s5 + $0x34] sm:$0xf] }
 0x10e   : > { %4104 = vmatpush3.bf16.xpose.msra.mxu0 %v5579_v13  ;;  %v2929_v36 = vor.u32 %v2928_v50, %v2924_v46  ;;  %v2723_v4 = vrot.slane %v2721_v11, 4  ;;  %v2726_v29 = vrot.slane %v2724_v57, 5  ;;  %v2734_v6 = vshrl.u32 %v5630_v21, 16 }
 0x10f   : > { %4202 = vmatprep.subr.msk.bf16.mxu0 %vm289_vm0, %v4305_v60  ;;  %v2920_v0 = vrot.slane %v2919_v39, 4  ;;  %v2732_v44 = vrot.slane %v2730_v28, 5  ;;  %v2740_v55 = vshll.u32 %v5638_v51, 16  ;;  %v3098_v1 = vsel %vm289_vm0, %v3918_v2, 0  ;;  %v4307_v60 = vld [vmem:[%s4460_s5 + $0x84] sm:$0xff]   ;;  %v4310_v28 = vld [vmem:[%s4460_s5 + $0x18] sm:$0xff]  }
 0x110   : > { %v2930_v13 = vrot.slane %v2929_v36, 4  ;;  %v2727_v58 = vor.u32 %v2726_v29, %v2723_v4  ;;  %v5654_v53 = vsel %vm289_vm0, %v4308_v7, 0  ;;  %4120 = vmatpush3.bf16.xpose.msra.mxu1 %v3098_v1  ;;  %v2736_v54 = vrot.slane %v2734_v6, 4  ;;  %v5677_v4 = vld [vmem:[%s4460_s5 + $0x38] sm:$0x1] }
 0x111   : > { %v2925_v19 = vsel %vm4495_vm3, %v2920_v0, %v2924_v46  ;;  %v2742_v42 = vrot.slane %v2740_v55, 5  ;;  %v2889_v32 = vshrl.u32 %v3895_v10, 16  ;;  %v2892_v5 = vshll.u32 %v3895_v10, 16  ;;  %v3892_v1 = vld [vmem:[%s4460_s5 + $0x84] sm:$0xf] }
 0x112   : > { %v2935_v63 = vsel %vm4495_vm3, %v2930_v13, %v2934_v14  ;;  %v2728_v16 = vrot.slane %v2727_v58, 4  ;;  %v2898_v27 = vshll.u32 %v5650_v17, 16  ;;  %v2737_v22 = vor.u32 %v2736_v54, %v2732_v44 }
 0x113   : > { %v3925_v38 = vcombine.low %v2925_v19, %v2935_v63  ;;  %v2891_v8 = vrot.slane %v2889_v32, 4  ;;  %v2902_v46 = vshrl.u32 %v5650_v17, 16  ;;  %v2894_v50 = vrot.slane %v2892_v5, 5  ;;  %v5692_v5 = vld [vmem:[%s4460_s5 + $0x88] sm:$0xf] }
 0x114   : > { %v2733_v62 = vsel %vm4495_vm3, %v2728_v16, %v2732_v44  ;;  %v2900_v11 = vrot.slane %v2898_v27, 5  ;;  %v2908_v57 = vshll.u32 %v5659_v45, 16  ;;  %v2738_v7 = vrot.slane %v2737_v22, 4  ;;  %v5698_v22 = vld [vmem:[%s4460_s5 + $0x8c] sm:$0x1] }
 0x115   : > { %4209 = vmatprep.subr.msk.bf16.mxu1 %vm289_vm0, %v3925_v38  ;;  %v2904_v43 = vrot.slane %v2902_v46, 4  ;;  %v2697_v39 = vshrl.u32 %v3871_v52, 16  ;;  %v2700_v14 = vshll.u32 %v3871_v52, 16  ;;  %v2895_v2 = vor.u32 %v2894_v50, %v2891_v8 }
 0x116   : > { %4106 = vmatpush3.bf16.xpose.msra.mxu0 %v5617_v25  ;;  %v2910_v36 = vrot.slane %v2908_v57, 5  ;;  %v2706_v29 = vshll.u32 %v5668_v15, 16  ;;  %v2710_v10 = vshrl.u32 %v5668_v15, 16  ;;  %v2743_v0 = vsel %vm4495_vm3, %v2738_v7, %v2742_v42  ;;  %v4309_v57 = vld [vmem:[%s4460_s5 + $0x78] sm:$0xff]  }
 0x117   : > { %4203 = vmatprep.subr.msk.bf16.mxu0 %vm289_vm0, %v4307_v60  ;;  %v2905_v44 = vor.u32 %v2904_v43, %v2900_v11  ;;  %v2699_v6 = vrot.slane %v2697_v39, 4  ;;  %v2702_v55 = vrot.slane %v2700_v14, 5  ;;  %v3917_v25 = vcombine.low %v2733_v62, %v2743_v0  ;;  %v3868_v43 = vld [vmem:[%s4460_s5 + $0x24] sm:$0xf] }
 0x118   : > { %v2896_v13 = vrot.slane %v2895_v2, 4  ;;  %v2708_v58 = vrot.slane %v2706_v29, 5  ;;  %v2712_v19 = vrot.slane %v2710_v10, 4  ;;  %v2716_v16 = vshll.u32 %v5677_v4, 16 }
 0x119   : > { %v2906_v32 = vrot.slane %v2905_v44, 4  ;;  %v2703_v63 = vor.u32 %v2702_v55, %v2699_v6  ;;  %v5689_v42 = vsel %vm289_vm0, %v4310_v28, 0  ;;  %v3095_v27 = vsel %vm289_vm0, %v3917_v25, 0  ;;  %v5712_v44 = vld [vmem:[%s4460_s5 + $0x28] sm:$0xf] }
 0x11a   : > { %v5685_v54 = vpop.f32.mrf.mxu0  ;;  %v2901_v52 = vsel %vm4495_vm3, %v2896_v13, %v2900_v11  ;;  %v2713_v38 = vor.u32 %v2712_v19, %v2708_v58  ;;  %v2865_v60 = vshrl.u32 %v3892_v1, 16  ;;  %4122 = vmatpush3.bf16.xpose.msra.mxu1 %v3095_v27  ;;  %v2718_v50 = vrot.slane %v2716_v16, 5  ;;  %v3946_v27 = vld [vmem:[%s4460_s5 + $0xcc] sm:$0xe] }
 0x11b   : > { %v2911_v46 = vsel %vm4495_vm3, %v2906_v32, %v2910_v36  ;;  %v2704_v62 = vrot.slane %v2703_v63, 4  ;;  %v2868_v7 = vshll.u32 %v3892_v1, 16  ;;  %v2874_v28 = vshll.u32 %v5692_v5, 16  ;;  %v5719_v1 = vld [vmem:[%s4460_s5 + $0x2c] sm:$0x1] }
 0x11c   : > { %v5700_v8 = vpop.f32.mrf.mxu0  ;;  %v3924_v39 = vcombine.low %v2901_v52, %v2911_v46  ;;  %v2714_v14 = vrot.slane %v2713_v38, 4  ;;  %v2867_v11 = vrot.slane %v2865_v60, 4  ;;  %v2878_v0 = vshrl.u32 %v5692_v5, 16 }
 0x11d   : > { %v2709_v29 = vsel %vm4495_vm3, %v2704_v62, %v2708_v58  ;;  %v2870_v10 = vrot.slane %v2868_v7, 5  ;;  %v2884_v36 = vshll.u32 %v5698_v22, 16  ;;  %v2876_v55 = vrot.slane %v2874_v28, 5  ;;  %v3889_v28 = vld [vmem:[%s4460_s5 + $0x78] sm:$0xf] }
 0x11e   : > { %v379_v2 = vpop.f32.mrf.mxu0  ;;  %4108 = vmatpush3.bf16.xpose.msra.mxu0 %v5654_v53  ;;  %4210 = vmatprep.subr.msk.bf16.mxu1 %vm289_vm0, %v3924_v39  ;;  %v2719_v6 = vsel %vm4495_vm3, %v2714_v14, %v2718_v50  ;;  %v2673_v25 = vshrl.u32 %v3868_v43, 16  ;;  %v2676_v13 = vshll.u32 %v3868_v43, 16  ;;  %v2880_v63 = vrot.slane %v2878_v0, 4  ;;  %v174_v43 = vpop.permute.xlu0 %173 }
 0x11f   : > { %v3916_v19 = vcombine.low %v2709_v29, %v2719_v6  ;;  %4204 = vmatprep.subr.msk.bf16.mxu0 %vm289_vm0, %v4309_v57  ;;  %v2871_v32 = vor.u32 %v2870_v10, %v2867_v11  ;;  %v2886_v16 = vrot.slane %v2884_v36, 5  ;;  %v2682_v38 = vshll.u32 %v5712_v44, 16 }
 0x120   : > { %v380_v58 = vpop.f32.mrf.mxu0  ;;  %v2675_v53 = vrot.slane %v2673_v25, 4  ;;  %v2678_v52 = vrot.slane %v2676_v13, 5  ;;  %v2686_v60 = vshrl.u32 %v5712_v44, 16  ;;  %v2881_v50 = vor.u32 %v2880_v63, %v2876_v55  ;;  %v5743_v63 = vld [vmem:[%s4460_s5 + $0x80] sm:$0x1] }
 0x121   : > { %v3092_v46 = vsel %vm289_vm0, %v3916_v19, 0  ;;  %v2872_v62 = vrot.slane %v2871_v32, 4  ;;  %v2692_v7 = vshll.u32 %v5719_v1, 16  ;;  %v2684_v39 = vrot.slane %v2682_v38, 5  ;;  %v5736_v58 = vld [vmem:[%s4460_s5 + $0x7c] sm:$0xf] }
 0x122   : > { %v2679_v57 = vor.u32 %v2678_v52, %v2675_v53  ;;  %v2688_v14 = vrot.slane %v2686_v60, 4  ;;  %v3962_v11 = vrot.slane %v3946_v27, 9  ;;  %4124 = vmatpush3.bf16.xpose.msra.mxu1 %v3092_v46  ;;  %v2882_v29 = vrot.slane %v2881_v50, 4  ;;  %v3938_v52 = vld [vmem:[%s4460_s5 + $0x6c] sm:$0xe] }
 0x123   : > { %v2877_v2 = vsel %vm4495_vm3, %v2872_v62, %v2876_v55  ;;  %v2694_v10 = vrot.slane %v2692_v7, 5  ;;  %v3347_v0 = vrot.slane %v5449_v48, 5  ;;  %v3350_v25 = vrot.slane %v5452_v20, 5 }
 0x124   : > { %v2680_v36 = vrot.slane %v2679_v57, 4  ;;  %v2689_v6 = vor.u32 %v2688_v14, %v2684_v39  ;;  %v5733_v13 = vadd.f32 %v5685_v54, %v174_v43  ;;  %v2887_v19 = vsel %vm4495_vm3, %v2882_v29, %v2886_v16  ;;  %v3865_v57 = vld [vmem:[%s4460_s5 + $0x18] sm:$0xf] }
 0x125   : > { %v3348_v55 = vsel %vm4704_vm6, %v3962_v11, %v3347_v0  ;;  %v3349_v32 = vrot.slane %v3347_v0, 4  ;;  %v2841_v48 = vshrl.u32 %v3889_v28, 16  ;;  %v3923_v27 = vcombine.low %v2877_v2, %v2887_v19 }
 0x126   : > { %4110 = vmatpush3.bf16.xpose.msra.mxu0 %v5689_v42  ;;  %v2685_v20 = vsel %vm4495_vm3, %v2680_v36, %v2684_v39  ;;  %v2690_v54 = vrot.slane %v2689_v6, 4  ;;  %v2844_v53 = vshll.u32 %v3889_v28, 16  ;;  %v2850_v60 = vshll.u32 %v5736_v58, 16  ;;  %v5762_v6 = vld [vmem:[%s4460_s5 + $0x1c] sm:$0xf] }
 0x127   : > { %v3351_v16 = vsel %vm4704_vm6, %v3349_v32, %v3350_v25  ;;  %v2843_v38 = vrot.slane %v2841_v48, 4  ;;  %v2854_v46 = vshrl.u32 %v5736_v58, 16  ;;  %4211 = vmatprep.subr.msk.bf16.mxu1 %vm289_vm0, %v3923_v27  ;;  %v2860_v7 = vshll.u32 %v5743_v63, 16  ;;  %v5772_v48 = vld [vmem:[%s5960_s1 + $0x20] sm:$0xf] }
 0x128   : > { %v2695_v42 = vsel %vm4495_vm3, %v2690_v54, %v2694_v10  ;;  %v3979_v62 = vcombine.low %v3348_v55, %v3351_v16  ;;  %v2846_v50 = vrot.slane %v2844_v53, 5  ;;  %v2852_v14 = vrot.slane %v2850_v60, 5  ;;  %v5767_v55 = vld [vmem:[%s4460_s5 + $0x20] sm:$0x1] }
 0x129   : > { %v3915_v39 = vcombine.low %v2685_v20, %v2695_v42  ;;  %v2856_v11 = vrot.slane %v2854_v46, 4  ;;  %v3954_v28 = vrot.slane %v3938_v52, 9  ;;  %v2862_v29 = vrot.slane %v2860_v7, 5  ;;  %v3945_v52 = vld [vmem:[%s4460_s5 + $0xc0] sm:$0xe] }
 0x12a   : > { %4213 = vmatprep.subr.msk.bf16.mxu0 %vm289_vm0, %v3979_v62  ;;  %v2847_v2 = vor.u32 %v2846_v50, %v2843_v38  ;;  %v3291_v0 = vrot.slane %v5465_v31, 5  ;;  %v3294_v36 = vrot.slane %v5474_v12, 5  ;;  %v383_v19 = vadd.f32 %v5700_v8, %v174_v43  ;;  %v3937_v7 = vld [vmem:[%s4460_s5 + $0x60] sm:$0xe] }
 0x12b   : > { %v3089_v10 = vsel %vm289_vm0, %v3915_v39, 0  ;;  %v2857_v25 = vor.u32 %v2856_v11, %v2852_v14  ;;  %v2649_v32 = vshrl.u32 %v3865_v57, 16  ;;  %v2652_v20 = vshll.u32 %v3865_v57, 16 }
 0x12c   : > { %4126 = vmatpush3.bf16.xpose.msra.mxu1 %v3089_v10  ;;  %v2848_v31 = vrot.slane %v2847_v2, 4  ;;  %v3292_v12 = vsel %vm4704_vm6, %v3954_v28, %v3291_v0  ;;  %v3293_v27 = vrot.slane %v3291_v0, 4  ;;  %v2658_v54 = vshll.u32 %v5762_v6, 16  ;;  %v3944_v28 = vld [vmem:[%s4460_s5 + $0xb4] sm:$0xe] }
 0x12d   : > { %4112 = vmatmul.mubr.msk.bf16.vlgmr.msra.gmra.mxu0 %vm289_vm0, %v5488_v3  ;;  %v2858_v8 = vrot.slane %v2857_v25, 4  ;;  %v2651_v43 = vrot.slane %v2649_v32, 4  ;;  %v2662_v53 = vshrl.u32 %v5762_v6, 16  ;;  %v2654_v60 = vrot.slane %v2652_v20, 5 }
 0x12e   : > { %v2853_v16 = vsel %vm4495_vm3, %v2848_v31, %v2852_v14  ;;  %v3295_v38 = vsel %vm4704_vm6, %v3293_v27, %v3294_v36  ;;  %v2668_v46 = vshll.u32 %v5767_v55, 16  ;;  %4147 = vmatprep.mubr.msk.bf16.mxu0 %vm289_vm0, %v5772_v48  ;;  %v2660_v62 = vrot.slane %v2658_v54, 5 }
 0x12f   : > { %v2863_v3 = vsel %vm4495_vm3, %v2858_v8, %v2862_v29  ;;  %v3971_v42 = vcombine.low %v3292_v12, %v3295_v38  ;;  %v2664_v50 = vrot.slane %v2662_v53, 4  ;;  %v2655_v39 = vor.u32 %v2654_v60, %v2651_v43  ;;  %v3943_v60 = vld [vmem:[%s4460_s5 + $0xa8] sm:$0xe] }
 0x130   : > { %v3922_v57 = vcombine.low %v2853_v16, %v2863_v3  ;;  %v2670_v11 = vrot.slane %v2668_v46, 5  ;;  %v3961_v14 = vrot.slane %v3945_v52, 9  ;;  %v3340_v36 = vrot.slane %v5480_v18, 5 }
 0x131   : > { %v3427_v2 = vsel %vm289_vm0, %v3971_v42, 0  ;;  %v2665_v0 = vor.u32 %v2664_v50, %v2660_v62  ;;  %v3343_v10 = vrot.slane %v5496_v30, 5  ;;  %v2656_v29 = vrot.slane %v2655_v39, 4 }
 0x132   : > { %4212 = vmatprep.subr.msk.bf16.mxu1 %vm289_vm0, %v3922_v57  ;;  %4132 = vmatpush3.bf16.xpose.msra.mxu0 %v3427_v2  ;;  %v3953_v25 = vrot.slane %v3937_v7, 9  ;;  %v3284_v32 = vrot.slane %v5510_v9, 5  ;;  %v3287_v31 = vrot.slane %v5518_v41, 5  ;;  %v3341_v27 = vsel %vm4704_vm6, %v3961_v14, %v3340_v36  ;;  %v3936_v9 = vld [vmem:[%s4460_s5 + $0x54] sm:$0xe] }
 0x133   : > { %v2666_v12 = vrot.slane %v2665_v0, 4  ;;  %v3342_v20 = vrot.slane %v3340_v36, 4  ;;  %v3960_v8 = vrot.slane %v3944_v28, 9  ;;  %v2661_v18 = vsel %vm4495_vm3, %v2656_v29, %v2660_v62  ;;  %v954_v30 = vpop.f32.mrf.mxu1  ;;  %v3935_v14 = vld [vmem:[%s4460_s5 + $0x48] sm:$0xe] }
 0x134   : > { %v3285_v43 = vsel %vm4704_vm6, %v3953_v25, %v3284_v32  ;;  %v3286_v54 = vrot.slane %v3284_v32, 4  ;;  %v3333_v53 = vrot.slane %v5527_v61, 5  ;;  %v5811_v16 = vadd.f32 %v954_v30, %v5733_v13 }
 0x135   : > { %v2671_v41 = vsel %vm4495_vm3, %v2666_v12, %v2670_v11  ;;  %v3344_v52 = vsel %vm4704_vm6, %v3342_v20, %v3343_v10  ;;  %v3336_v38 = vrot.slane %v5545_v35, 5  ;;  %v956_v61 = vpop.f32.mrf.mxu1  ;;  %v3952_v57 = vrot.slane %v3936_v9, 9 }
 0x136   : > { %v3914_v46 = vcombine.low %v2661_v18, %v2671_v41  ;;  %v3978_v3 = vcombine.low %v3341_v27, %v3344_v52  ;;  %v3288_v42 = vsel %vm4704_vm6, %v3286_v54, %v3287_v31  ;;  %v3334_v33 = vsel %vm4704_vm6, %v3960_v8, %v3333_v53  ;;  %v3942_v27 = vld [vmem:[%s4460_s5 + $0x9c] sm:$0xe] }
 0x137   : > { %v3970_v62 = vcombine.low %v3285_v43, %v3288_v42  ;;  %v5819_v50 = vadd.f32 %v956_v61, %v383_v19  ;;  %v3335_v7 = vrot.slane %v3333_v53, 4  ;;  %v3277_v35 = vrot.slane %v5557_v37, 5  ;;  %v958_v28 = vpop.f32.mrf.mxu1  ;;  %v3934_v41 = vld [vmem:[%s4460_s5 + $0x3c] sm:$0xe]  ;;  %v3941_v42 = vld [vmem:[%s4460_s5 + $0x90] sm:$0xe] }
 0x138   : > { %v3086_v13 = vsel %vm289_vm0, %v3914_v46, 0  ;;  %4214 = vmatprep.subr.msk.bf16.mxu0 %vm289_vm0, %v3978_v3  ;;  %v3280_v39 = vrot.slane %v5565_v49, 5  ;;  %v3959_v11 = vrot.slane %v3943_v60, 9  ;;  %v3326_v0 = vrot.slane %v5575_v23, 5 }
 0x139   : > { %4128 = vmatpush3.bf16.xpose.msra.mxu1 %v3086_v13  ;;  %v3424_v2 = vsel %vm289_vm0, %v3970_v62, 0  ;;  %v3337_v19 = vsel %vm4704_vm6, %v3335_v7, %v3336_v38  ;;  %v3329_v36 = vrot.slane %v5582_v24, 5  ;;  %v3278_v37 = vsel %vm4704_vm6, %v3952_v57, %v3277_v35  ;;  %v959_v29 = vpop.f32.mrf.mxu1 }
 0x13a   : > { %4134 = vmatpush3.bf16.xpose.msra.mxu0 %v3424_v2  ;;  %v3977_v10 = vcombine.low %v3334_v33, %v3337_v19  ;;  %v3279_v49 = vrot.slane %v3277_v35, 4  ;;  %v3328_v25 = vrot.slane %v3326_v0, 4  ;;  %v3951_v32 = vrot.slane %v3935_v14, 9 }
 0x13b   : > { %v3270_v31 = vrot.slane %v5594_v47, 5  ;;  %v3327_v23 = vsel %vm4704_vm6, %v3959_v11, %v3326_v0  ;;  %v3273_v24 = vrot.slane %v5601_v56, 5  ;;  %v3319_v20 = vrot.slane %v5612_v34, 5  ;;  %v3940_v0 = vld [vmem:[%s4460_s5 + $0x84] sm:$0xe] }
 0x13c   : > { %4215 = vmatprep.subr.msk.bf16.mxu0 %vm289_vm0, %v3977_v10  ;;  %v3281_v12 = vsel %vm4704_vm6, %v3279_v49, %v3280_v39  ;;  %v3330_v18 = vsel %vm4704_vm6, %v3328_v25, %v3329_v36  ;;  %v3958_v54 = vrot.slane %v3942_v27, 9  ;;  %v3322_v53 = vrot.slane %v5622_v59, 5  ;;  %v3933_v39 = vld [vmem:[%s4460_s5 + $0x30] sm:$0xe]  ;;  %v3939_v27 = vld [vmem:[%s4460_s5 + $0x78] sm:$0xe] }
 0x13d   : > { %v3969_v8 = vcombine.low %v3278_v37, %v3281_v12  ;;  %v3272_v30 = vrot.slane %v3270_v31, 4  ;;  %v3976_v43 = vcombine.low %v3327_v23, %v3330_v18  ;;  %v3271_v56 = vsel %vm4704_vm6, %v3951_v32, %v3270_v31  ;;  %v3932_v32 = vld [vmem:[%s4460_s5 + $0x24] sm:$0xe] }
 0x13e   : > { %v3321_v9 = vrot.slane %v3319_v20, 4  ;;  %v3263_v52 = vrot.slane %v5630_v21, 5  ;;  %v3320_v59 = vsel %vm4704_vm6, %v3958_v54, %v3319_v20  ;;  %v3950_v60 = vrot.slane %v3934_v41, 9 }
 0x13f   : > { %v3421_v47 = vsel %vm289_vm0, %v3969_v8, 0  ;;  %v3274_v34 = vsel %vm4704_vm6, %v3272_v30, %v3273_v24  ;;  %v3266_v3 = vrot.slane %v5638_v51, 5  ;;  %v3312_v61 = vrot.slane %v5650_v17, 5 }
 0x140   : > { %4130 = vmatmul.mubr.msk.bf16.vlgmr.msra.gmra.mxu1 %vm289_vm0, %v5538_v26  ;;  %v3968_v38 = vcombine.low %v3271_v56, %v3274_v34  ;;  %v3323_v26 = vsel %vm4704_vm6, %v3321_v9, %v3322_v53  ;;  %v3265_v46 = vrot.slane %v3263_v52, 4  ;;  %v3264_v62 = vsel %vm4704_vm6, %v3950_v60, %v3263_v52  ;;  %v3931_v56 = vld [vmem:[%s4460_s5 + $0x18] sm:$0xe]  ;;  %s161_s5 = sand.u32 1, %s4364_s13  }
 0x141   : > { %v3975_v33 = vcombine.low %v3320_v59, %v3323_v26  ;;  %v3957_v7 = vrot.slane %v3941_v42, 9  ;;  %v3314_v13 = vrot.slane %v3312_v61, 4  ;;  %v3315_v35 = vrot.slane %v5659_v45, 5  ;;  %s3578_s7 = sshll.u32 %s161_s5, 4  ;;  %s3501_s20 = scalar_lea.sflag [#allocation3], %s161_s5 }
 0x142   : > { %4136 = vmatpush3.bf16.xpose.msra.mxu0 %v3421_v47  ;;  %v3418_v21 = vsel %vm289_vm0, %v3968_v38, 0  ;;  %v3267_v57 = vsel %vm4704_vm6, %v3265_v46, %v3266_v3  ;;  %v3256_v51 = vrot.slane %v5668_v15, 5  ;;  %v3949_v14 = vrot.slane %v3933_v39, 9  ;;  %s163_s9 = scalar_lea.vmem [#allocation2], %s3578_s7 }
 0x143   : > { %4216 = vmatprep.subr.msk.bf16.mxu0 %vm289_vm0, %v3976_v43  ;;  %v3967_v17 = vcombine.low %v3264_v62, %v3267_v57  ;;  %v3313_v11 = vsel %vm4704_vm6, %v3957_v7, %v3312_v61  ;;  %v3316_v28 = vsel %vm4704_vm6, %v3314_v13, %v3315_v35  ;;  %v3259_v19 = vrot.slane %v5677_v4, 5  ;;  %s3515_s10 = sshll.u32 %s163_s9, 4  ;;  %s3516_s10 = int_to_ptr.vmem [resolvable:$true] %s3515_s10 }
 0x144   : > { %v3258_v2 = vrot.slane %v3256_v51, 4  ;;  %v3305_v45 = vrot.slane %v5692_v5, 5  ;;  %v3974_v36 = vcombine.low %v3313_v11, %v3316_v28  ;;  %v3956_v10 = vrot.slane %v3940_v0, 9  ;;  %s4312_s24 = scalar_lea.vmem %s3516_s10, 256  ;;  %p4319_p0 = scmp.lt.s32.totalorder %s3516_s10, %s4317_s25 }
 0x145   : > { %v3415_v15 = vsel %vm289_vm0, %v3967_v17, 0  ;;  %v3308_v37 = vrot.slane %v5698_v22, 5  ;;  %v3257_v49 = vsel %vm4704_vm6, %v3949_v14, %v3256_v51  ;;  %v3249_v4 = vrot.slane %v5712_v44, 5  ;;  %p4313_p11 = scmp.ne.s32.totalorder %s3516_s10, %s4312_s24  ;;  %p4320_p1 = scmp.lt.s32.totalorder %s4318_s26, %s4312_s24 }
 0x146   : > { %v3260_v29 = vsel %vm4704_vm6, %v3258_v2, %v3259_v19  ;;  %v3307_v25 = vrot.slane %v3305_v45, 4  ;;  %v3306_v31 = vsel %vm4704_vm6, %v3956_v10, %v3305_v45  ;;  %v3948_v12 = vrot.slane %v3932_v32, 9 }
 0x147   : > { %v3966_v5 = vcombine.low %v3257_v49, %v3260_v29  ;;  %v3251_v23 = vrot.slane %v3249_v4, 4  ;;  %v3252_v24 = vrot.slane %v5719_v1, 5  ;;  %v3298_v20 = vrot.slane %v5736_v58, 5  ;;  %p4314_p12 = pnand %p4313_p11, %p4434_p5  ;;  %p4321_p2 = por %p4320_p1, %p4319_p0 }
 0x148   : > { %v3309_v22 = vsel %vm4704_vm6, %v3307_v25, %v3308_v37  ;;  %v3250_v18 = vsel %vm4704_vm6, %v3948_v12, %v3249_v4  ;;  %v3955_v30 = vrot.slane %v3939_v27, 9  ;;  %v3301_v54 = vrot.slane %v5743_v63, 5 }
 0x149   : > { %v3412_v44 = vsel %vm289_vm0, %v3966_v5, 0  ;;  %v3973_v8 = vcombine.low %v3306_v31, %v3309_v22  ;;  %v3253_v47 = vsel %vm4704_vm6, %v3251_v23, %v3252_v24  ;;  %v3300_v43 = vrot.slane %v3298_v20, 4  ;;  %p4315_p13 = pneg %p4314_p12 }
 0x14a   : > { %4138 = vmatpush3.bf16.xpose.msra.mxu0 %v3418_v21  ;;  %v3242_v53 = vrot.slane %v5762_v6, 5  ;;  %v3965_v1 = vcombine.low %v3250_v18, %v3253_v47  ;;  %v3299_v58 = vsel %vm4704_vm6, %v3955_v30, %v3298_v20  ;;  %v3947_v9 = vrot.slane %v3931_v56, 9 }
 0x14b   : > { %4217 = vmatprep.subr.msk.bf16.mxu0 %vm289_vm0, %v3975_v33  ;;  %v3302_v34 = vsel %vm4704_vm6, %v3300_v43, %v3301_v54  ;;  %v3245_v52 = vrot.slane %v5767_v55, 5  ;;  %p4322_p3 = pnand %p4321_p2, %p4315_p13 }
 0x14c   : > { %v3244_v41 = vrot.slane %v3242_v53, 4  ;;  %v3409_v38 = vsel %vm289_vm0, %v3965_v1, 0  ;;  %v3972_v63 = vcombine.low %v3299_v58, %v3302_v34  ;;  %v3243_v6 = vsel %vm4704_vm6, %v3947_v9, %v3242_v53 }
 0x14e   : > { %v3246_v59 = vsel %vm4704_vm6, %v3244_v41, %v3245_v52 }
 0x14f   : > { %v3964_v60 = vcombine.low %v3243_v6, %v3246_v59 }
 0x151   : > { %v3406_v3 = vsel %vm289_vm0, %v3964_v60, 0 }
 0x152   : > { %4140 = vmatpush3.bf16.xpose.msra.mxu0 %v3415_v15 }
 0x153   : > { %4218 = vmatprep.subr.msk.bf16.mxu0 %vm289_vm0, %v3974_v36 }
 0x15a   : > { %4142 = vmatpush3.bf16.xpose.msra.mxu0 %v3412_v44 }
 0x15b   : > { %4219 = vmatprep.subr.msk.bf16.mxu0 %vm289_vm0, %v3973_v8 }
 0x162   : > { %4144 = vmatpush3.bf16.xpose.msra.mxu0 %v3409_v38 }
 0x163   : > { %4220 = vmatprep.subr.msk.bf16.mxu0 %vm289_vm0, %v3972_v63 }
 0x165   : > { %v1277_v26 = vpop.f32.mrf.mxu0 }
 0x166   : > { %v1284_v46 = vadd.f32 %v1277_v26, %v5811_v16 }
 0x167   : > { %v1279_v42 = vpop.f32.mrf.mxu0 }
 0x168   : > { %v1285_v55 = vadd.f32 %v1279_v42, %v5819_v50 }
 0x169   : > { %v1281_v61 = vpop.f32.mrf.mxu0 }
 0x16a   : > { %4146 = vmatpush3.bf16.xpose.msra.mxu0 %v3406_v3 }
 0x16b   : > { %v1282_v21 = vpop.f32.mrf.mxu0 }
 0x171   : > { %4148 = vmatmul.mubr.msk.bf16.vlgmr.msra.gmra.mxu0 %vm289_vm0, %v5772_v48 }
 0x173   : > { %v1486_v40 = vpop.f32.mrf.mxu1 }
 0x174   : > { %v1493_v33 = vadd.f32 %v1486_v40, %v1284_v46 }
 0x175   : > { %v1488_v62 = vpop.f32.mrf.mxu1 }
 0x176   : > { %v1494_v7 = vadd.f32 %v1488_v62, %v1285_v55 }
 0x177   : > { %v1490_v57 = vpop.f32.mrf.mxu1 }
 0x179   : > { %v1491_v13 = vpop.f32.mrf.mxu1 }
 0x1ad   : > { %v2062_v35 = vpop.f32.mrf.mxu0 }
 0x1ae   : > { %v2069_v39 = vadd.f32 %v2062_v35, %v1493_v33 }
 0x1af   : > { %v2064_v16 = vpop.f32.mrf.mxu0 }
 0x1b0   : > { %v2070_v51 = vadd.f32 %v2064_v16, %v1494_v7 }
 0x1b1   : > { %v2066_v17 = vpop.f32.mrf.mxu0 }
 0x1b3   : > { %v2067_v11 = vpop.f32.mrf.mxu0 }
 0x1b6   : > { %v2382_v14 = vpop.f32.mrf.mxu1 }
 0x1b7   : > { %v2389_v50 = vadd.f32 %v2382_v14, %v2069_v39 }
 0x1b8   : > { %v2384_v28 = vpop.f32.mrf.mxu1 }
 0x1b9   : > { %v2390_v2 = vadd.f32 %v2384_v28, %v2070_v51 }
 0x1ba   : > { %v2386_v19 = vpop.f32.mrf.mxu1 }
 0x1bc   : > { %v2387_v0 = vpop.f32.mrf.mxu1 }
 0x1ed   : > { %v2591_v48 = vpop.f32.mrf.mxu0 }
 0x1ee   : > { %v2598_v45 = vadd.f32 %v2591_v48, %v2389_v50 }
 0x1ef   : > { %v2593_v15 = vpop.f32.mrf.mxu0 }
 0x1f0   : > { %v2599_v36 = vadd.f32 %v2593_v15, %v2390_v2 }
 0x1f1   : > { %v2595_v10 = vpop.f32.mrf.mxu0 }
 0x1f3   : > { %v2596_v37 = vpop.f32.mrf.mxu0 }
 0x200   : > { %v3167_v49 = vpop.f32.mrf.mxu1 }
 0x201   : > { %v3174_v4 = vadd.f32 %v3167_v49, %v2598_v45 }
 0x202   : > { %v3169_v29 = vpop.f32.mrf.mxu1 }
 0x203   : > { %v3175_v31 = vadd.f32 %v3169_v29, %v2599_v36 }
 0x204   : > { %v3171_v25 = vpop.f32.mrf.mxu1 }
 0x206   : > { %v3172_v32 = vpop.f32.mrf.mxu1 }
 0x231   : > { %v3487_v5 = vpop.f32.mrf.mxu0 }
 0x232   : > { %v3494_v12 = vadd.f32 %v3487_v5, %v3174_v4 }
 0x233   : > { %v3489_v22 = vpop.f32.mrf.mxu0 }
 0x234   : > { %v3496_v23 = vmax.f32 %v3494_v12, 0.0  ;;  %v3495_v24 = vadd.f32 %v3489_v22, %v3175_v31 }
 0x235   : > { %v3491_v27 = vpop.f32.mrf.mxu0 }
 0x236   : > { %3498 = vst [vmem:[%s163_s9] sm:$0xff] %v3496_v23  ;;  %v3497_v20 = vmax.f32 %v3495_v24, 0.0 }
 0x237   : > { %v3492_v44 = vpop.f32.mrf.mxu0 }
 0x238   : > { %3499 = vst [vmem:[%s163_s9 + $0x8] sm:$0xff] %v3497_v20 }
 0x239   : > { %4325 = shalt.err (!%p4322_p3)
}
 0x23a   : > { %s4326_s27 = scalar_lea.hbm %s5924_s19, 256  ;;  %s4330_s30 = scalar_lea.hbm %s5962_s3, 512 }
 0x23b   : > { %p4327_p4 = scmp.ne.s32.totalorder %s5924_s19, %s4326_s27  ;;  %p4331_p9 = scmp.lt.s32.totalorder %s5924_s19, %s5962_s3 }
 0x23c   : > { %p4332_p10 = scmp.lt.s32.totalorder %s4330_s30, %s4326_s27 }
 0x23d   : > { %p4328_p7 = pnand %p4327_p4, %p4434_p5 }
 0x23e   : > { %p4333_p11 = por %p4332_p10, %p4331_p9 }
 0x23f   : > { %p4329_p8 = pneg %p4328_p7 }
 0x241   : > { %p4334_p12 = pnand %p4333_p11, %p4329_p8 }
 0x243   : > { %4337 = shalt.err (!%p4334_p12)
}
 0x244   : > { %4222 = dma.vmem_to_hbm [thread:$0]  (%p4434_p5), %s3516_s10, 256, %s5924_s19, %s3501_s20  }
 0x245 PF: > { %p4228_p13 = scmp.ge.s32.totalorder %s4372_s15, 2  ;;  %s3527_s5 = sand.u32 1, %s4360_s12  }
 0x246   : > { %s3528_s7 = scalar_lea.sflag [#allocation3], %s3527_s5 }
 0x247   : > { %p4225_p0 = pnand %p4228_p13, %p4438_p6 }
 0x249   : > { %p4226_p1 = pneg %p4225_p0 }
 0x24b   : > { %4355 = dma.done.wait (%p4226_p1), %s3528_s7, 256  }
 0x24c   : > { %4357 = vsyncadd (%p4226_p1), %s3528_s7, 4294967040  ;;  %p13_p2 = scmp.ge.s32.totalorder %s4421_s18, 4   ;;  %s5969_s12 = smov %s4364_s13 }
 0x24d   : > { %s5970_s13 = smov %s4368_s14  ;;  %s5971_s14 = smov %s4432_s21 }
 0x24e   : > { %s5972_s15 = smov %s4421_s18  ;;  %15 = sbr.rel (!%p13_p2) target bundleno = 3 (0x3), region = 77 }
 0x253   :  { %3533 = vsyncpa [#allocation3], 1 }
 0x254   :  { %3535 = vsyncpa [#allocation3 + $0x1], 1 }

</bundles_post_ra>
